<compile_context>
chip_gen: v7x
topology: tpu7x:2x2x1
jax: 0.10.0
libtpu: 0.0.40
codegen_flags: <defaults>
</compile_context>

<pallas_src>
import jax
import jax.numpy as jnp
from jax.experimental import pallas as pl
from jax.experimental.pallas import tpu as pltpu


def lstm_cell_kernel(feat_ref, w_lin_ref, b_lin_ref, w_ih_ref, w_hh_ref,
                     b_lstm_ref, h0_ref, c0_ref, out_ref, gates_scr):
    T, B, V = out_ref.shape

    # ---- Hoisted, time-parallel x-path (bf16 MXU operands, f32 accumulate) --
    x = feat_ref[...]                                            # (T*B, F) bf16
    v = jnp.dot(x, w_lin_ref[...], preferred_element_type=jnp.float32)
    v = jnp.maximum(v + b_lin_ref[...], 0.0)                     # ReLU (Dropout=id)
    # Park the per-timestep gate contributions in VMEM scratch so they are NOT
    # a 32-vreg live value spanning the unrolled recurrence.
    gates_scr[...] = (
        jnp.dot(v.astype(jnp.bfloat16), w_ih_ref[...],
                preferred_element_type=jnp.float32)
        + b_lstm_ref[...])                                       # (T*B, 4V) f32

    # ---- Serial recurrence: only h @ W_hh^T on the critical chain -----------
    h = h0_ref[...]                                              # (B, V) f32
    c = c0_ref[...]                                              # (B, V) f32
    for t in range(T):                                           # static -> unrolled
        # Read W_hh from its VMEM ref per use (no 64-vreg live range / spills);
        # reload this step's 4-vreg gates_x slice from scratch (off the serial
        # dependency, hidden under the matmul).
        gates = gates_scr[pl.ds(t * B, B), :] + jnp.dot(
            h.astype(jnp.bfloat16), w_hh_ref[...],
            preferred_element_type=jnp.float32)                  # (B, 4V) f32
        # Gate order (wrapper-permuted) is [i, f, o, g]:
        #   one contiguous sigmoid slab (B, 3V), one tanh slab (B, V).
        # sigmoid(x) = 0.5*tanh(0.5*x) + 0.5  -> single EUP push per slab chunk.
        sig = 0.5 * jnp.tanh(0.5 * gates[:, 0:3 * V]) + 0.5
        i_g = sig[:, 0 * V:1 * V]
        f_g = sig[:, 1 * V:2 * V]
        o_g = sig[:, 2 * V:3 * V]
        g_g = jnp.tanh(gates[:, 3 * V:4 * V])
        c = f_g * c + i_g * g_g
        h = o_g * jnp.tanh(c)
        out_ref[t] = h                                           # lane-dense (B, V)


def fold_params(params, eps=1e-5):
    """One-time parameter preparation (outside the per-call hot path).

    Folds BN eval statistics and the Linear bias into the linear weights,
    pre-transposes weights so the kernel does x @ W, merges the two LSTM
    biases, permutes gate order [i, f, g, o] -> [i, f, o, g], and casts
    matmul weights to bf16.
    """
    (w_lin, b_lin, bn_gamma, bn_beta, bn_mean, bn_var,
     w_ih, w_hh, b_ih, b_hh) = params
    V = w_lin.shape[0]

    inv_std = 1.0 / jnp.sqrt(bn_var + eps)
    bn_scale = bn_gamma * inv_std                                 # (V,)
    bn_shift = bn_beta - bn_mean * bn_scale                       # (V,)
    w_lin_f = (w_lin.T * bn_scale[None, :]).astype(jnp.bfloat16)  # (F, V) bf16
    b_lin_f = (b_lin * bn_scale + bn_shift).reshape(1, V)         # (1, V) f32

    def reorder(w):  # rows [i, f, g, o] -> [i, f, o, g]
        return jnp.concatenate(
            [w[0:2 * V], w[3 * V:4 * V], w[2 * V:3 * V]], axis=0)

    w_ih_t = reorder(w_ih).T.astype(jnp.bfloat16)                 # (V, 4V) bf16
    w_hh_t = reorder(w_hh).T.astype(jnp.bfloat16)                 # (V, 4V) bf16
    b_lstm = (reorder(b_ih) + reorder(b_hh)).reshape(1, 4 * V)    # (1, 4V) f32

    return w_lin_f, b_lin_f, w_ih_t, w_hh_t, b_lstm


@jax.jit
def lstm_cell_forward(feat, h0, c0, folded_params):
    """feat: (T, B, F); h0, c0: (B, V). Returns v_series: (T, B, V) f32."""
    T, B, F = feat.shape
    V = h0.shape[-1]
    w_lin_f, b_lin_f, w_ih_t, w_hh_t, b_lstm = folded_params

    feat2d = feat.reshape(T * B, F).astype(jnp.bfloat16)          # (T*B, F)

    vmem = pl.BlockSpec(memory_space=pltpu.MemorySpace.VMEM)

    return pl.pallas_call(
        lstm_cell_kernel,
        out_shape=jax.ShapeDtypeStruct((T, B, V), jnp.float32),
        in_specs=[vmem] * 8,
        out_specs=vmem,
        scratch_shapes=[pltpu.VMEM((T * B, 4 * V), jnp.float32)],
    )(feat2d, w_lin_f, b_lin_f, w_ih_t, w_hh_t, b_lstm, h0, c0)


def reference_forward(feat, h0, c0, params):
    """Pure-JAX f32 reference mirroring the PyTorch forward (eval mode)."""
    (w_lin, b_lin, bn_gamma, bn_beta, bn_mean, bn_var,
     w_ih, w_hh, b_ih, b_hh) = params
    eps = 1e-5
    V = h0.shape[-1]
    h, c = h0, c0
    outs = []
    for t in range(feat.shape[0]):
        v = feat[t] @ w_lin.T + b_lin
        v = (v - bn_mean) / jnp.sqrt(bn_var + eps) * bn_gamma + bn_beta
        v = jnp.maximum(v, 0.0)
        gates = v @ w_ih.T + b_ih + h @ w_hh.T + b_hh
        i_g = jax.nn.sigmoid(gates[:, 0 * V:1 * V])
        f_g = jax.nn.sigmoid(gates[:, 1 * V:2 * V])
        g_g = jnp.tanh(gates[:, 2 * V:3 * V])
        o_g = jax.nn.sigmoid(gates[:, 3 * V:4 * V])
        c = f_g * c + i_g * g_g
        h = o_g * jnp.tanh(c)
        outs.append(h)
    return jnp.stack(outs, axis=0)


if __name__ == "__main__":
    # args.extract_feat_dim=128, args.v_class=128, args.batch_size=8, args.temporal=8
    T, B, F, V = 8, 8, 128, 128

    key = jax.random.PRNGKey(0)
    keys = jax.random.split(key, 12)

    feat = jax.random.normal(keys[0], (T, B, F), jnp.float32)
    h0 = jax.random.normal(keys[1], (B, V), jnp.float32) * 0.1
    c0 = jax.random.normal(keys[2], (B, V), jnp.float32) * 0.1

    def uniform(k, shape, bound):
        return jax.random.uniform(k, shape, jnp.float32, -bound, bound)

    # Deterministic parameter init (PyTorch-style uniform bounds).
    lin_bound = 1.0 / jnp.sqrt(F)
    lstm_bound = 1.0 / jnp.sqrt(V)
    params = (
        uniform(keys[3], (V, F), lin_bound),        # Linear weight
        uniform(keys[4], (V,), lin_bound),          # Linear bias
        jnp.ones((V,), jnp.float32),                # BN gamma
        jnp.zeros((V,), jnp.float32),               # BN beta
        jnp.zeros((V,), jnp.float32),               # BN running_mean
        jnp.ones((V,), jnp.float32),                # BN running_var
        uniform(keys[5], (4 * V, V), lstm_bound),   # LSTM W_ih
        uniform(keys[6], (4 * V, V), lstm_bound),   # LSTM W_hh
        uniform(keys[7], (4 * V,), lstm_bound),     # LSTM b_ih
        uniform(keys[8], (4 * V,), lstm_bound),     # LSTM b_hh
    )

    # Fold / permute / cast parameters ONCE (outside the per-call hot path).
    folded = fold_params(params)
    folded = jax.block_until_ready(folded)

    v_series = lstm_cell_forward(feat, h0, c0, folded)
    v_series = jax.block_until_ready(v_series)

    ref = reference_forward(feat, h0, c0, params)
    assert v_series.shape == (T, B, V)
    # bf16 MXU operands over an 8-step recurrence -> loosened tolerance
    # (element-wise / state math and accumulation stay f32).
    assert jnp.allclose(v_series, ref, atol=5e-2, rtol=5e-2), \
        f"max abs err {jnp.max(jnp.abs(v_series - ref))}"

    print("KERNEL_OK")
</pallas_src>

<mosaic_0001>
module attributes {stable_mosaic.version = 11 : i64} {
  func.func @lstm_cell_kernel(%arg0: memref<64x128xbf16, #tpu.memory_space<vmem>>, %arg1: memref<128x128xbf16, #tpu.memory_space<vmem>>, %arg2: memref<1x128xf32, #tpu.memory_space<vmem>>, %arg3: memref<128x512xbf16, #tpu.memory_space<vmem>>, %arg4: memref<128x512xbf16, #tpu.memory_space<vmem>>, %arg5: memref<1x512xf32, #tpu.memory_space<vmem>>, %arg6: memref<8x128xf32, #tpu.memory_space<vmem>>, %arg7: memref<8x128xf32, #tpu.memory_space<vmem>>, %arg8: memref<8x8x128xf32, #tpu.memory_space<vmem>>, %arg9: memref<64x512xf32, #tpu.memory_space<vmem>>) attributes {dimension_semantics = [], scalar_prefetch = 0 : i64, scratch_operands = 1 : i64, tpu.core_type = #tpu.core_type<tc>} {
    %c0 = arith.constant 0 : index
    %c0_0 = arith.constant 0 : index
    %0 = vector.load %arg0[%c0, %c0_0] : memref<64x128xbf16, #tpu.memory_space<vmem>>, vector<64x128xbf16>
    %c0_1 = arith.constant 0 : index
    %c0_2 = arith.constant 0 : index
    %1 = vector.load %arg1[%c0_1, %c0_2] : memref<128x128xbf16, #tpu.memory_space<vmem>>, vector<128x128xbf16>
    %cst = arith.constant dense<0.000000e+00> : vector<64x128xf32>
    %2 = tpu.matmul %0, %1, %cst {dimension_numbers = #tpu.dot_dimension_numbers<[1], [0], [0], [1], [0, 0, 1, 1], [], []>} : vector<64x128xbf16>, vector<128x128xbf16>, vector<64x128xf32> -> vector<64x128xf32>
    %c0_3 = arith.constant 0 : index
    %c0_4 = arith.constant 0 : index
    %3 = vector.load %arg2[%c0_3, %c0_4] : memref<1x128xf32, #tpu.memory_space<vmem>>, vector<1x128xf32>
    %4 = vector.broadcast %3 : vector<1x128xf32> to vector<64x128xf32>
    %5 = arith.addf %2, %4 : vector<64x128xf32>
    %cst_5 = arith.constant 0.000000e+00 : f32
    %6 = vector.broadcast %cst_5 : f32 to vector<64x128xf32>
    %7 = arith.maximumf %5, %6 : vector<64x128xf32>
    %8 = arith.truncf %7 : vector<64x128xf32> to vector<64x128xbf16>
    %c0_6 = arith.constant 0 : index
    %c0_7 = arith.constant 0 : index
    %9 = vector.load %arg3[%c0_6, %c0_7] : memref<128x512xbf16, #tpu.memory_space<vmem>>, vector<128x512xbf16>
    %cst_8 = arith.constant dense<0.000000e+00> : vector<64x512xf32>
    %10 = tpu.matmul %8, %9, %cst_8 {dimension_numbers = #tpu.dot_dimension_numbers<[1], [0], [0], [1], [0, 0, 1, 1], [], []>} : vector<64x128xbf16>, vector<128x512xbf16>, vector<64x512xf32> -> vector<64x512xf32>
    %c0_9 = arith.constant 0 : index
    %c0_10 = arith.constant 0 : index
    %11 = vector.load %arg5[%c0_9, %c0_10] : memref<1x512xf32, #tpu.memory_space<vmem>>, vector<1x512xf32>
    %12 = vector.broadcast %11 : vector<1x512xf32> to vector<64x512xf32>
    %13 = arith.addf %10, %12 : vector<64x512xf32>
    %c0_11 = arith.constant 0 : index
    %c0_12 = arith.constant 0 : index
    %14 = vector.load %arg9[%c0_11, %c0_12] : memref<64x512xf32, #tpu.memory_space<vmem>>, vector<64x512xf32>
    tpu.vector_store %arg9[%c0_11, %c0_12], %13 {strides = array<i32>} : memref<64x512xf32, #tpu.memory_space<vmem>>, vector<64x512xf32>,
    %c0_13 = arith.constant 0 : index
    %c0_14 = arith.constant 0 : index
    %15 = vector.load %arg6[%c0_13, %c0_14] : memref<8x128xf32, #tpu.memory_space<vmem>>, vector<8x128xf32>
    %c0_15 = arith.constant 0 : index
    %c0_16 = arith.constant 0 : index
    %16 = vector.load %arg7[%c0_15, %c0_16] : memref<8x128xf32, #tpu.memory_space<vmem>>, vector<8x128xf32>
    %c0_17 = arith.constant 0 : index
    %c0_18 = arith.constant 0 : index
    %17 = vector.load %arg9[%c0_17, %c0_18] : memref<64x512xf32, #tpu.memory_space<vmem>>, vector<8x512xf32>
    %18 = arith.truncf %15 : vector<8x128xf32> to vector<8x128xbf16>
    %c0_19 = arith.constant 0 : index
    %c0_20 = arith.constant 0 : index
    %19 = vector.load %arg4[%c0_19, %c0_20] : memref<128x512xbf16, #tpu.memory_space<vmem>>, vector<128x512xbf16>
    %cst_21 = arith.constant dense<0.000000e+00> : vector<8x512xf32>
    %20 = tpu.matmul %18, %19, %cst_21 {dimension_numbers = #tpu.dot_dimension_numbers<[1], [0], [0], [1], [0, 0, 1, 1], [], []>} : vector<8x128xbf16>, vector<128x512xbf16>, vector<8x512xf32> -> vector<8x512xf32>
    %21 = arith.addf %17, %20 : vector<8x512xf32>
    %22 = vector.extract_strided_slice %21 {offsets = [0, 0], sizes = [8, 384], strides = [1, 1]} : vector<8x512xf32> to vector<8x384xf32>
    %cst_22 = arith.constant 5.000000e-01 : f32
    %23 = vector.broadcast %cst_22 : f32 to vector<8x384xf32>
    %24 = arith.mulf %23, %22 : vector<8x384xf32>
    %25 = math.tanh %24 : vector<8x384xf32>
    %cst_23 = arith.constant 5.000000e-01 : f32
    %26 = vector.broadcast %cst_23 : f32 to vector<8x384xf32>
    %27 = arith.mulf %26, %25 : vector<8x384xf32>
    %cst_24 = arith.constant 5.000000e-01 : f32
    %28 = vector.broadcast %cst_24 : f32 to vector<8x384xf32>
    %29 = arith.addf %27, %28 : vector<8x384xf32>
    %30 = vector.extract_strided_slice %29 {offsets = [0, 0], sizes = [8, 128], strides = [1, 1]} : vector<8x384xf32> to vector<8x128xf32>
    %31 = vector.extract_strided_slice %29 {offsets = [0, 128], sizes = [8, 128], strides = [1, 1]} : vector<8x384xf32> to vector<8x128xf32>
    %32 = vector.extract_strided_slice %29 {offsets = [0, 256], sizes = [8, 128], strides = [1, 1]} : vector<8x384xf32> to vector<8x128xf32>
    %33 = vector.extract_strided_slice %21 {offsets = [0, 384], sizes = [8, 128], strides = [1, 1]} : vector<8x512xf32> to vector<8x128xf32>
    %34 = math.tanh %33 : vector<8x128xf32>
    %35 = arith.mulf %31, %16 : vector<8x128xf32>
    %36 = arith.mulf %30, %34 : vector<8x128xf32>
    %37 = arith.addf %35, %36 : vector<8x128xf32>
    %38 = math.tanh %37 : vector<8x128xf32>
    %39 = arith.mulf %32, %38 : vector<8x128xf32>
    %c0_25 = arith.constant 0 : index
    %c0_26 = arith.constant 0 : index
    %c0_27 = arith.constant 0 : index
    %40 = vector.load %arg8[%c0_25, %c0_26, %c0_27] : memref<8x8x128xf32, #tpu.memory_space<vmem>>, vector<1x8x128xf32>
    %41 = vector.shape_cast %40 : vector<1x8x128xf32> to vector<8x128xf32>
    %42 = vector.shape_cast %39 : vector<8x128xf32> to vector<1x8x128xf32>
    tpu.vector_store %arg8[%c0_25, %c0_26, %c0_27], %42 {strides = array<i32>} : memref<8x8x128xf32, #tpu.memory_space<vmem>>, vector<1x8x128xf32>,
    %c8 = arith.constant 8 : index
    %c0_28 = arith.constant 0 : index
    %43 = vector.load %arg9[%c8, %c0_28] : memref<64x512xf32, #tpu.memory_space<vmem>>, vector<8x512xf32>
    %44 = arith.truncf %39 : vector<8x128xf32> to vector<8x128xbf16>
    %c0_29 = arith.constant 0 : index
    %c0_30 = arith.constant 0 : index
    %45 = vector.load %arg4[%c0_29, %c0_30] : memref<128x512xbf16, #tpu.memory_space<vmem>>, vector<128x512xbf16>
    %cst_31 = arith.constant dense<0.000000e+00> : vector<8x512xf32>
    %46 = tpu.matmul %44, %45, %cst_31 {dimension_numbers = #tpu.dot_dimension_numbers<[1], [0], [0], [1], [0, 0, 1, 1], [], []>} : vector<8x128xbf16>, vector<128x512xbf16>, vector<8x512xf32> -> vector<8x512xf32>
    %47 = arith.addf %43, %46 : vector<8x512xf32>
    %48 = vector.extract_strided_slice %47 {offsets = [0, 0], sizes = [8, 384], strides = [1, 1]} : vector<8x512xf32> to vector<8x384xf32>
    %cst_32 = arith.constant 5.000000e-01 : f32
    %49 = vector.broadcast %cst_32 : f32 to vector<8x384xf32>
    %50 = arith.mulf %49, %48 : vector<8x384xf32>
    %51 = math.tanh %50 : vector<8x384xf32>
    %cst_33 = arith.constant 5.000000e-01 : f32
    %52 = vector.broadcast %cst_33 : f32 to vector<8x384xf32>
    %53 = arith.mulf %52, %51 : vector<8x384xf32>
    %cst_34 = arith.constant 5.000000e-01 : f32
    %54 = vector.broadcast %cst_34 : f32 to vector<8x384xf32>
    %55 = arith.addf %53, %54 : vector<8x384xf32>
    %56 = vector.extract_strided_slice %55 {offsets = [0, 0], sizes = [8, 128], strides = [1, 1]} : vector<8x384xf32> to vector<8x128xf32>
    %57 = vector.extract_strided_slice %55 {offsets = [0, 128], sizes = [8, 128], strides = [1, 1]} : vector<8x384xf32> to vector<8x128xf32>
    %58 = vector.extract_strided_slice %55 {offsets = [0, 256], sizes = [8, 128], strides = [1, 1]} : vector<8x384xf32> to vector<8x128xf32>
    %59 = vector.extract_strided_slice %47 {offsets = [0, 384], sizes = [8, 128], strides = [1, 1]} : vector<8x512xf32> to vector<8x128xf32>
    %60 = math.tanh %59 : vector<8x128xf32>
    %61 = arith.mulf %57, %37 : vector<8x128xf32>
    %62 = arith.mulf %56, %60 : vector<8x128xf32>
    %63 = arith.addf %61, %62 : vector<8x128xf32>
    %64 = math.tanh %63 : vector<8x128xf32>
    %65 = arith.mulf %58, %64 : vector<8x128xf32>
    %c1 = arith.constant 1 : index
    %c0_35 = arith.constant 0 : index
    %c0_36 = arith.constant 0 : index
    %66 = vector.load %arg8[%c1, %c0_35, %c0_36] : memref<8x8x128xf32, #tpu.memory_space<vmem>>, vector<1x8x128xf32>
    %67 = vector.shape_cast %66 : vector<1x8x128xf32> to vector<8x128xf32>
    %68 = vector.shape_cast %65 : vector<8x128xf32> to vector<1x8x128xf32>
    tpu.vector_store %arg8[%c1, %c0_35, %c0_36], %68 {strides = array<i32>} : memref<8x8x128xf32, #tpu.memory_space<vmem>>, vector<1x8x128xf32>,
    %c16 = arith.constant 16 : index
    %c0_37 = arith.constant 0 : index
    %69 = vector.load %arg9[%c16, %c0_37] : memref<64x512xf32, #tpu.memory_space<vmem>>, vector<8x512xf32>
    %70 = arith.truncf %65 : vector<8x128xf32> to vector<8x128xbf16>
    %c0_38 = arith.constant 0 : index
    %c0_39 = arith.constant 0 : index
    %71 = vector.load %arg4[%c0_38, %c0_39] : memref<128x512xbf16, #tpu.memory_space<vmem>>, vector<128x512xbf16>
    %cst_40 = arith.constant dense<0.000000e+00> : vector<8x512xf32>
    %72 = tpu.matmul %70, %71, %cst_40 {dimension_numbers = #tpu.dot_dimension_numbers<[1], [0], [0], [1], [0, 0, 1, 1], [], []>} : vector<8x128xbf16>, vector<128x512xbf16>, vector<8x512xf32> -> vector<8x512xf32>
    %73 = arith.addf %69, %72 : vector<8x512xf32>
    %74 = vector.extract_strided_slice %73 {offsets = [0, 0], sizes = [8, 384], strides = [1, 1]} : vector<8x512xf32> to vector<8x384xf32>
    %cst_41 = arith.constant 5.000000e-01 : f32
    %75 = vector.broadcast %cst_41 : f32 to vector<8x384xf32>
    %76 = arith.mulf %75, %74 : vector<8x384xf32>
    %77 = math.tanh %76 : vector<8x384xf32>
    %cst_42 = arith.constant 5.000000e-01 : f32
    %78 = vector.broadcast %cst_42 : f32 to vector<8x384xf32>
    %79 = arith.mulf %78, %77 : vector<8x384xf32>
    %cst_43 = arith.constant 5.000000e-01 : f32
    %80 = vector.broadcast %cst_43 : f32 to vector<8x384xf32>
    %81 = arith.addf %79, %80 : vector<8x384xf32>
    %82 = vector.extract_strided_slice %81 {offsets = [0, 0], sizes = [8, 128], strides = [1, 1]} : vector<8x384xf32> to vector<8x128xf32>
    %83 = vector.extract_strided_slice %81 {offsets = [0, 128], sizes = [8, 128], strides = [1, 1]} : vector<8x384xf32> to vector<8x128xf32>
    %84 = vector.extract_strided_slice %81 {offsets = [0, 256], sizes = [8, 128], strides = [1, 1]} : vector<8x384xf32> to vector<8x128xf32>
    %85 = vector.extract_strided_slice %73 {offsets = [0, 384], sizes = [8, 128], strides = [1, 1]} : vector<8x512xf32> to vector<8x128xf32>
    %86 = math.tanh %85 : vector<8x128xf32>
    %87 = arith.mulf %83, %63 : vector<8x128xf32>
    %88 = arith.mulf %82, %86 : vector<8x128xf32>
    %89 = arith.addf %87, %88 : vector<8x128xf32>
    %90 = math.tanh %89 : vector<8x128xf32>
    %91 = arith.mulf %84, %90 : vector<8x128xf32>
    %c2 = arith.constant 2 : index
    %c0_44 = arith.constant 0 : index
    %c0_45 = arith.constant 0 : index
    %92 = vector.load %arg8[%c2, %c0_44, %c0_45] : memref<8x8x128xf32, #tpu.memory_space<vmem>>, vector<1x8x128xf32>
    %93 = vector.shape_cast %92 : vector<1x8x128xf32> to vector<8x128xf32>
    %94 = vector.shape_cast %91 : vector<8x128xf32> to vector<1x8x128xf32>
    tpu.vector_store %arg8[%c2, %c0_44, %c0_45], %94 {strides = array<i32>} : memref<8x8x128xf32, #tpu.memory_space<vmem>>, vector<1x8x128xf32>,
    %c24 = arith.constant 24 : index
    %c0_46 = arith.constant 0 : index
    %95 = vector.load %arg9[%c24, %c0_46] : memref<64x512xf32, #tpu.memory_space<vmem>>, vector<8x512xf32>
    %96 = arith.truncf %91 : vector<8x128xf32> to vector<8x128xbf16>
    %c0_47 = arith.constant 0 : index
    %c0_48 = arith.constant 0 : index
    %97 = vector.load %arg4[%c0_47, %c0_48] : memref<128x512xbf16, #tpu.memory_space<vmem>>, vector<128x512xbf16>
    %cst_49 = arith.constant dense<0.000000e+00> : vector<8x512xf32>
    %98 = tpu.matmul %96, %97, %cst_49 {dimension_numbers = #tpu.dot_dimension_numbers<[1], [0], [0], [1], [0, 0, 1, 1], [], []>} : vector<8x128xbf16>, vector<128x512xbf16>, vector<8x512xf32> -> vector<8x512xf32>
    %99 = arith.addf %95, %98 : vector<8x512xf32>
    %100 = vector.extract_strided_slice %99 {offsets = [0, 0], sizes = [8, 384], strides = [1, 1]} : vector<8x512xf32> to vector<8x384xf32>
    %cst_50 = arith.constant 5.000000e-01 : f32
    %101 = vector.broadcast %cst_50 : f32 to vector<8x384xf32>
    %102 = arith.mulf %101, %100 : vector<8x384xf32>
    %103 = math.tanh %102 : vector<8x384xf32>
    %cst_51 = arith.constant 5.000000e-01 : f32
    %104 = vector.broadcast %cst_51 : f32 to vector<8x384xf32>
    %105 = arith.mulf %104, %103 : vector<8x384xf32>
    %cst_52 = arith.constant 5.000000e-01 : f32
    %106 = vector.broadcast %cst_52 : f32 to vector<8x384xf32>
    %107 = arith.addf %105, %106 : vector<8x384xf32>
    %108 = vector.extract_strided_slice %107 {offsets = [0, 0], sizes = [8, 128], strides = [1, 1]} : vector<8x384xf32> to vector<8x128xf32>
    %109 = vector.extract_strided_slice %107 {offsets = [0, 128], sizes = [8, 128], strides = [1, 1]} : vector<8x384xf32> to vector<8x128xf32>
    %110 = vector.extract_strided_slice %107 {offsets = [0, 256], sizes = [8, 128], strides = [1, 1]} : vector<8x384xf32> to vector<8x128xf32>
    %111 = vector.extract_strided_slice %99 {offsets = [0, 384], sizes = [8, 128], strides = [1, 1]} : vector<8x512xf32> to vector<8x128xf32>
    %112 = math.tanh %111 : vector<8x128xf32>
    %113 = arith.mulf %109, %89 : vector<8x128xf32>
    %114 = arith.mulf %108, %112 : vector<8x128xf32>
    %115 = arith.addf %113, %114 : vector<8x128xf32>
    %116 = math.tanh %115 : vector<8x128xf32>
    %117 = arith.mulf %110, %116 : vector<8x128xf32>
    %c3 = arith.constant 3 : index
    %c0_53 = arith.constant 0 : index
    %c0_54 = arith.constant 0 : index
    %118 = vector.load %arg8[%c3, %c0_53, %c0_54] : memref<8x8x128xf32, #tpu.memory_space<vmem>>, vector<1x8x128xf32>
    %119 = vector.shape_cast %118 : vector<1x8x128xf32> to vector<8x128xf32>
    %120 = vector.shape_cast %117 : vector<8x128xf32> to vector<1x8x128xf32>
    tpu.vector_store %arg8[%c3, %c0_53, %c0_54], %120 {strides = array<i32>} : memref<8x8x128xf32, #tpu.memory_space<vmem>>, vector<1x8x128xf32>,
    %c32 = arith.constant 32 : index
    %c0_55 = arith.constant 0 : index
    %121 = vector.load %arg9[%c32, %c0_55] : memref<64x512xf32, #tpu.memory_space<vmem>>, vector<8x512xf32>
    %122 = arith.truncf %117 : vector<8x128xf32> to vector<8x128xbf16>
    %c0_56 = arith.constant 0 : index
    %c0_57 = arith.constant 0 : index
    %123 = vector.load %arg4[%c0_56, %c0_57] : memref<128x512xbf16, #tpu.memory_space<vmem>>, vector<128x512xbf16>
    %cst_58 = arith.constant dense<0.000000e+00> : vector<8x512xf32>
    %124 = tpu.matmul %122, %123, %cst_58 {dimension_numbers = #tpu.dot_dimension_numbers<[1], [0], [0], [1], [0, 0, 1, 1], [], []>} : vector<8x128xbf16>, vector<128x512xbf16>, vector<8x512xf32> -> vector<8x512xf32>
    %125 = arith.addf %121, %124 : vector<8x512xf32>
    %126 = vector.extract_strided_slice %125 {offsets = [0, 0], sizes = [8, 384], strides = [1, 1]} : vector<8x512xf32> to vector<8x384xf32>
    %cst_59 = arith.constant 5.000000e-01 : f32
    %127 = vector.broadcast %cst_59 : f32 to vector<8x384xf32>
    %128 = arith.mulf %127, %126 : vector<8x384xf32>
    %129 = math.tanh %128 : vector<8x384xf32>
    %cst_60 = arith.constant 5.000000e-01 : f32
    %130 = vector.broadcast %cst_60 : f32 to vector<8x384xf32>
    %131 = arith.mulf %130, %129 : vector<8x384xf32>
    %cst_61 = arith.constant 5.000000e-01 : f32
    %132 = vector.broadcast %cst_61 : f32 to vector<8x384xf32>
    %133 = arith.addf %131, %132 : vector<8x384xf32>
    %134 = vector.extract_strided_slice %133 {offsets = [0, 0], sizes = [8, 128], strides = [1, 1]} : vector<8x384xf32> to vector<8x128xf32>
    %135 = vector.extract_strided_slice %133 {offsets = [0, 128], sizes = [8, 128], strides = [1, 1]} : vector<8x384xf32> to vector<8x128xf32>
    %136 = vector.extract_strided_slice %133 {offsets = [0, 256], sizes = [8, 128], strides = [1, 1]} : vector<8x384xf32> to vector<8x128xf32>
    %137 = vector.extract_strided_slice %125 {offsets = [0, 384], sizes = [8, 128], strides = [1, 1]} : vector<8x512xf32> to vector<8x128xf32>
    %138 = math.tanh %137 : vector<8x128xf32>
    %139 = arith.mulf %135, %115 : vector<8x128xf32>
    %140 = arith.mulf %134, %138 : vector<8x128xf32>
    %141 = arith.addf %139, %140 : vector<8x128xf32>
    %142 = math.tanh %141 : vector<8x128xf32>
    %143 = arith.mulf %136, %142 : vector<8x128xf32>
    %c4 = arith.constant 4 : index
    %c0_62 = arith.constant 0 : index
    %c0_63 = arith.constant 0 : index
    %144 = vector.load %arg8[%c4, %c0_62, %c0_63] : memref<8x8x128xf32, #tpu.memory_space<vmem>>, vector<1x8x128xf32>
    %145 = vector.shape_cast %144 : vector<1x8x128xf32> to vector<8x128xf32>
    %146 = vector.shape_cast %143 : vector<8x128xf32> to vector<1x8x128xf32>
    tpu.vector_store %arg8[%c4, %c0_62, %c0_63], %146 {strides = array<i32>} : memref<8x8x128xf32, #tpu.memory_space<vmem>>, vector<1x8x128xf32>,
    %c40 = arith.constant 40 : index
    %c0_64 = arith.constant 0 : index
    %147 = vector.load %arg9[%c40, %c0_64] : memref<64x512xf32, #tpu.memory_space<vmem>>, vector<8x512xf32>
    %148 = arith.truncf %143 : vector<8x128xf32> to vector<8x128xbf16>
    %c0_65 = arith.constant 0 : index
    %c0_66 = arith.constant 0 : index
    %149 = vector.load %arg4[%c0_65, %c0_66] : memref<128x512xbf16, #tpu.memory_space<vmem>>, vector<128x512xbf16>
    %cst_67 = arith.constant dense<0.000000e+00> : vector<8x512xf32>
    %150 = tpu.matmul %148, %149, %cst_67 {dimension_numbers = #tpu.dot_dimension_numbers<[1], [0], [0], [1], [0, 0, 1, 1], [], []>} : vector<8x128xbf16>, vector<128x512xbf16>, vector<8x512xf32> -> vector<8x512xf32>
    %151 = arith.addf %147, %150 : vector<8x512xf32>
    %152 = vector.extract_strided_slice %151 {offsets = [0, 0], sizes = [8, 384], strides = [1, 1]} : vector<8x512xf32> to vector<8x384xf32>
    %cst_68 = arith.constant 5.000000e-01 : f32
    %153 = vector.broadcast %cst_68 : f32 to vector<8x384xf32>
    %154 = arith.mulf %153, %152 : vector<8x384xf32>
    %155 = math.tanh %154 : vector<8x384xf32>
    %cst_69 = arith.constant 5.000000e-01 : f32
    %156 = vector.broadcast %cst_69 : f32 to vector<8x384xf32>
    %157 = arith.mulf %156, %155 : vector<8x384xf32>
    %cst_70 = arith.constant 5.000000e-01 : f32
    %158 = vector.broadcast %cst_70 : f32 to vector<8x384xf32>
    %159 = arith.addf %157, %158 : vector<8x384xf32>
    %160 = vector.extract_strided_slice %159 {offsets = [0, 0], sizes = [8, 128], strides = [1, 1]} : vector<8x384xf32> to vector<8x128xf32>
    %161 = vector.extract_strided_slice %159 {offsets = [0, 128], sizes = [8, 128], strides = [1, 1]} : vector<8x384xf32> to vector<8x128xf32>
    %162 = vector.extract_strided_slice %159 {offsets = [0, 256], sizes = [8, 128], strides = [1, 1]} : vector<8x384xf32> to vector<8x128xf32>
    %163 = vector.extract_strided_slice %151 {offsets = [0, 384], sizes = [8, 128], strides = [1, 1]} : vector<8x512xf32> to vector<8x128xf32>
    %164 = math.tanh %163 : vector<8x128xf32>
    %165 = arith.mulf %161, %141 : vector<8x128xf32>
    %166 = arith.mulf %160, %164 : vector<8x128xf32>
    %167 = arith.addf %165, %166 : vector<8x128xf32>
    %168 = math.tanh %167 : vector<8x128xf32>
    %169 = arith.mulf %162, %168 : vector<8x128xf32>
    %c5 = arith.constant 5 : index
    %c0_71 = arith.constant 0 : index
    %c0_72 = arith.constant 0 : index
    %170 = vector.load %arg8[%c5, %c0_71, %c0_72] : memref<8x8x128xf32, #tpu.memory_space<vmem>>, vector<1x8x128xf32>
    %171 = vector.shape_cast %170 : vector<1x8x128xf32> to vector<8x128xf32>
    %172 = vector.shape_cast %169 : vector<8x128xf32> to vector<1x8x128xf32>
    tpu.vector_store %arg8[%c5, %c0_71, %c0_72], %172 {strides = array<i32>} : memref<8x8x128xf32, #tpu.memory_space<vmem>>, vector<1x8x128xf32>,
    %c48 = arith.constant 48 : index
    %c0_73 = arith.constant 0 : index
    %173 = vector.load %arg9[%c48, %c0_73] : memref<64x512xf32, #tpu.memory_space<vmem>>, vector<8x512xf32>
    %174 = arith.truncf %169 : vector<8x128xf32> to vector<8x128xbf16>
    %c0_74 = arith.constant 0 : index
    %c0_75 = arith.constant 0 : index
    %175 = vector.load %arg4[%c0_74, %c0_75] : memref<128x512xbf16, #tpu.memory_space<vmem>>, vector<128x512xbf16>
    %cst_76 = arith.constant dense<0.000000e+00> : vector<8x512xf32>
    %176 = tpu.matmul %174, %175, %cst_76 {dimension_numbers = #tpu.dot_dimension_numbers<[1], [0], [0], [1], [0, 0, 1, 1], [], []>} : vector<8x128xbf16>, vector<128x512xbf16>, vector<8x512xf32> -> vector<8x512xf32>
    %177 = arith.addf %173, %176 : vector<8x512xf32>
    %178 = vector.extract_strided_slice %177 {offsets = [0, 0], sizes = [8, 384], strides = [1, 1]} : vector<8x512xf32> to vector<8x384xf32>
    %cst_77 = arith.constant 5.000000e-01 : f32
    %179 = vector.broadcast %cst_77 : f32 to vector<8x384xf32>
    %180 = arith.mulf %179, %178 : vector<8x384xf32>
    %181 = math.tanh %180 : vector<8x384xf32>
    %cst_78 = arith.constant 5.000000e-01 : f32
    %182 = vector.broadcast %cst_78 : f32 to vector<8x384xf32>
    %183 = arith.mulf %182, %181 : vector<8x384xf32>
    %cst_79 = arith.constant 5.000000e-01 : f32
    %184 = vector.broadcast %cst_79 : f32 to vector<8x384xf32>
    %185 = arith.addf %183, %184 : vector<8x384xf32>
    %186 = vector.extract_strided_slice %185 {offsets = [0, 0], sizes = [8, 128], strides = [1, 1]} : vector<8x384xf32> to vector<8x128xf32>
    %187 = vector.extract_strided_slice %185 {offsets = [0, 128], sizes = [8, 128], strides = [1, 1]} : vector<8x384xf32> to vector<8x128xf32>
    %188 = vector.extract_strided_slice %185 {offsets = [0, 256], sizes = [8, 128], strides = [1, 1]} : vector<8x384xf32> to vector<8x128xf32>
    %189 = vector.extract_strided_slice %177 {offsets = [0, 384], sizes = [8, 128], strides = [1, 1]} : vector<8x512xf32> to vector<8x128xf32>
    %190 = math.tanh %189 : vector<8x128xf32>
    %191 = arith.mulf %187, %167 : vector<8x128xf32>
    %192 = arith.mulf %186, %190 : vector<8x128xf32>
    %193 = arith.addf %191, %192 : vector<8x128xf32>
    %194 = math.tanh %193 : vector<8x128xf32>
    %195 = arith.mulf %188, %194 : vector<8x128xf32>
    %c6 = arith.constant 6 : index
    %c0_80 = arith.constant 0 : index
    %c0_81 = arith.constant 0 : index
    %196 = vector.load %arg8[%c6, %c0_80, %c0_81] : memref<8x8x128xf32, #tpu.memory_space<vmem>>, vector<1x8x128xf32>
    %197 = vector.shape_cast %196 : vector<1x8x128xf32> to vector<8x128xf32>
    %198 = vector.shape_cast %195 : vector<8x128xf32> to vector<1x8x128xf32>
    tpu.vector_store %arg8[%c6, %c0_80, %c0_81], %198 {strides = array<i32>} : memref<8x8x128xf32, #tpu.memory_space<vmem>>, vector<1x8x128xf32>,
    %c56 = arith.constant 56 : index
    %c0_82 = arith.constant 0 : index
    %199 = vector.load %arg9[%c56, %c0_82] : memref<64x512xf32, #tpu.memory_space<vmem>>, vector<8x512xf32>
    %200 = arith.truncf %195 : vector<8x128xf32> to vector<8x128xbf16>
    %c0_83 = arith.constant 0 : index
    %c0_84 = arith.constant 0 : index
    %201 = vector.load %arg4[%c0_83, %c0_84] : memref<128x512xbf16, #tpu.memory_space<vmem>>, vector<128x512xbf16>
    %cst_85 = arith.constant dense<0.000000e+00> : vector<8x512xf32>
    %202 = tpu.matmul %200, %201, %cst_85 {dimension_numbers = #tpu.dot_dimension_numbers<[1], [0], [0], [1], [0, 0, 1, 1], [], []>} : vector<8x128xbf16>, vector<128x512xbf16>, vector<8x512xf32> -> vector<8x512xf32>
    %203 = arith.addf %199, %202 : vector<8x512xf32>
    %204 = vector.extract_strided_slice %203 {offsets = [0, 0], sizes = [8, 384], strides = [1, 1]} : vector<8x512xf32> to vector<8x384xf32>
    %cst_86 = arith.constant 5.000000e-01 : f32
    %205 = vector.broadcast %cst_86 : f32 to vector<8x384xf32>
    %206 = arith.mulf %205, %204 : vector<8x384xf32>
    %207 = math.tanh %206 : vector<8x384xf32>
    %cst_87 = arith.constant 5.000000e-01 : f32
    %208 = vector.broadcast %cst_87 : f32 to vector<8x384xf32>
    %209 = arith.mulf %208, %207 : vector<8x384xf32>
    %cst_88 = arith.constant 5.000000e-01 : f32
    %210 = vector.broadcast %cst_88 : f32 to vector<8x384xf32>
    %211 = arith.addf %209, %210 : vector<8x384xf32>
    %212 = vector.extract_strided_slice %211 {offsets = [0, 0], sizes = [8, 128], strides = [1, 1]} : vector<8x384xf32> to vector<8x128xf32>
    %213 = vector.extract_strided_slice %211 {offsets = [0, 128], sizes = [8, 128], strides = [1, 1]} : vector<8x384xf32> to vector<8x128xf32>
    %214 = vector.extract_strided_slice %211 {offsets = [0, 256], sizes = [8, 128], strides = [1, 1]} : vector<8x384xf32> to vector<8x128xf32>
    %215 = vector.extract_strided_slice %203 {offsets = [0, 384], sizes = [8, 128], strides = [1, 1]} : vector<8x512xf32> to vector<8x128xf32>
    %216 = math.tanh %215 : vector<8x128xf32>
    %217 = arith.mulf %213, %193 : vector<8x128xf32>
    %218 = arith.mulf %212, %216 : vector<8x128xf32>
    %219 = arith.addf %217, %218 : vector<8x128xf32>
    %220 = math.tanh %219 : vector<8x128xf32>
    %221 = arith.mulf %214, %220 : vector<8x128xf32>
    %c7 = arith.constant 7 : index
    %c0_89 = arith.constant 0 : index
    %c0_90 = arith.constant 0 : index
    %222 = vector.load %arg8[%c7, %c0_89, %c0_90] : memref<8x8x128xf32, #tpu.memory_space<vmem>>, vector<1x8x128xf32>
    %223 = vector.shape_cast %222 : vector<1x8x128xf32> to vector<8x128xf32>
    %224 = vector.shape_cast %221 : vector<8x128xf32> to vector<1x8x128xf32>
    tpu.vector_store %arg8[%c7, %c0_89, %c0_90], %224 {strides = array<i32>} : memref<8x8x128xf32, #tpu.memory_space<vmem>>, vector<1x8x128xf32>,
    return
  }
}

</mosaic_0001>

<bundles_post_ra>
// kernel: lstm_cell_forward.1
= control target key start
LH: loop header
LB: loop body
LE: loop exit
PB: predicated region body
PF: predicated region fallthrough
CT: control target
= control target key end

     0   :  { %13 = vsyncpa [#allocation4], 0  ;;  %s4386_s0 = inlined_call_operand.vmem [shape: bf16[64,128], index: 0, kind: input, shape index: {}]   ;;  %s4387_s1 = inlined_call_operand.vmem [shape: bf16[128,128], index: 1, kind: input, shape index: {}]   ;;  %s4388_s2 = inlined_call_operand.vmem [shape: f32[1,128], index: 2, kind: input, shape index: {}]   ;;  %s4389_s3 = inlined_call_operand.hbm [shape: bf16[128,512], index: 3, kind: input, shape index: {}]   ;;  %s4390_s4 = inlined_call_operand.hbm [shape: bf16[128,512], index: 4, kind: input, shape index: {}]   ;;  %s4391_s5 = inlined_call_operand.vmem [shape: f32[1,512], index: 5, kind: input, shape index: {}]   ;;  %s4392_s6 = inlined_call_operand.vmem [shape: f32[8,128], index: 6, kind: input, shape index: {}]   ;;  %s4393_s7 = inlined_call_operand.vmem [shape: f32[8,128], index: 7, kind: input, shape index: {}]   ;;  %s4394_s8 = inlined_call_operand.hbm [shape: f32[8,8,128], index: 8, kind: output, shape index: {}]  }
   0x1   :  { %14 = vsyncpa [#allocation7], 0 }
   0x2   :  { %15 = vsyncpa [#allocation5], 0  ;;  %s3727_s27 = smov [#allocation3]   ;;  %s3655_s9 = scalar_lea.hbm %s4389_s3, 4096 }
   0x3   :  { %s27_s28 = sshll.u32 %s3727_s27, 4  ;;  %p3656_p0 = scmp.ne.s32.totalorder %s4389_s3, %s3655_s9  ;;  %s28_s28 = int_to_ptr.vmem [resolvable:$true] %s27_s28 }
   0x4   :  { %p3659_p1 = scmp.lt.u32.totalorder %s3655_s9, %s4389_s3 }
   0x6   :  { %p3661_p2 = pnand %p3659_p1, %p3656_p0 }
   0x8   :  { %3664 = shalt.err (!%p3661_p2)
}
   0x9   :  { %s3665_s14 = scalar_lea.vmem %s28_s28, 4096  ;;  %p3670_p4 = scmp.lt.s32.totalorder %s28_s28, %s28_s28 }
   0xa   :  { %p3666_p3 = scmp.ne.s32.totalorder %s28_s28, %s3665_s14  ;;  %p3671_p5 = scmp.lt.s32.totalorder %s3665_s14, %s3665_s14 }
   0xc   :  { %p3672_p6 = por %p3671_p5, %p3670_p4 }
   0xe   :  { %p3673_p7 = pnand %p3672_p6, %p3666_p3 }
  0x10   :  { %3676 = shalt.err (!%p3673_p7)
}
  0x11   :  { %s3728_s15 = smov 256   ;;  %s3729_s16 = smov 16  }
  0x12   :  { %33 = dma.hbm_to_vmem [thread:$0]  %s4389_s3, 4096, %s28_s28, [#allocation4], %s3728_s15, %s3728_s15, %s3729_s16  }
  0x13   :  { %s3730_s19 = smov [#allocation6]   ;;  %s3677_s23 = scalar_lea.hbm %s4390_s4, 4096 }
  0x14   :  { %s39_s20 = sshll.u32 %s3730_s19, 4  ;;  %p3678_p8 = scmp.ne.s32.totalorder %s4390_s4, %s3677_s23  ;;  %s40_s20 = int_to_ptr.vmem [resolvable:$true] %s39_s20 }
  0x15   :  { %p3681_p9 = scmp.lt.u32.totalorder %s3677_s23, %s4390_s4 }
  0x17   :  { %p3683_p10 = pnand %p3681_p9, %p3678_p8 }
  0x19   :  { %3686 = shalt.err (!%p3683_p10)
}
  0x1a   :  { %s3687_s29 = scalar_lea.vmem %s40_s20, 4096  ;;  %p3692_p12 = scmp.lt.s32.totalorder %s40_s20, %s40_s20 }
  0x1b   :  { %p3688_p11 = scmp.ne.s32.totalorder %s40_s20, %s3687_s29  ;;  %p3693_p13 = scmp.lt.s32.totalorder %s3687_s29, %s3687_s29 }
  0x1d   :  { %p3694_p0 = por %p3693_p13, %p3692_p12 }
  0x1f   :  { %p3695_p1 = pnand %p3694_p0, %p3688_p11 }
  0x21   :  { %3698 = shalt.err (!%p3695_p1)
}
  0x22   :  { %45 = dma.hbm_to_vmem [thread:$0]  %s4390_s4, 4096, %s40_s20, [#allocation7], %s3728_s15, %s3728_s15, %s3729_s16  }
  0x23   :  { %3721 = dma.done.wait [#allocation4], 4096  }
  0x24   :  { %3722 = vsyncadd [#allocation4], 4294963200 }
  0x25   :  { %3723 = dma.done.wait [#allocation7], 4096  }
  0x26   :  { %3724 = vsyncadd [#allocation7], 4294963200  ;;  %v3419_v0 = vld [vmem:[%s4387_s1] sm:$0xff]   ;;  %v3420_v1 = vld [vmem:[%s4387_s1 + $0x8] sm:$0xff]   ;;  %v4395_v45 = vmov 0  }
  0x27   :  { %3387 = vmatprep.subr.bf16.mxu0 %v3419_v0  ;;  %v3421_v2 = vld [vmem:[%s4387_s1 + $0x10] sm:$0xff]   ;;  %v3422_v3 = vld [vmem:[%s4387_s1 + $0x18] sm:$0xff]   ;;  %v3427_v4 = vld [vmem:[%s4386_s0] sm:$0xff]   ;;  %485 = vmatprep.mubr.bf16.mxu1 %v4395_v45 }
  0x28   :  { %3388 = vmatpush3.bf16.msra.mxu0 %v3419_v0  ;;  %3403 = vmatprep.mubr.bf16.mxu0 %v3427_v4  ;;  %v3423_v5 = vld [vmem:[%s4387_s1 + $0x20] sm:$0xff]   ;;  %v3424_v10 = vld [vmem:[%s4387_s1 + $0x28] sm:$0xff]   ;;  %v3425_v12 = vld [vmem:[%s4387_s1 + $0x30] sm:$0xff]  }
  0x29   :  { %3389 = vmatprep.subr.bf16.mxu0 %v3420_v1  ;;  %v3431_v6 = vld [vmem:[#allocation3 + $0x4] ss:$16 sps:$4 sm:$0xff]   ;;  %v3433_v7 = vld [vmem:[#allocation3] ss:$16 sps:$4 sm:$0xff]   ;;  %v3426_v15 = vld [vmem:[%s4387_s1 + $0x38] sm:$0xff]  }
  0x2a   :  { %453 = vmatprep.subr.bf16.mxu1 %v3431_v6  ;;  %v3437_v8 = vld [vmem:[#allocation3 + $0x24] ss:$16 sps:$4 sm:$0xff]   ;;  %v3439_v9 = vld [vmem:[#allocation3 + $0x20] ss:$16 sps:$4 sm:$0xff]   ;;  %v3436_v18 = vld [vmem:[#allocation3 + $0xc] ss:$16 sps:$4 sm:$0xff]  }
  0x2b   :  { %454 = vmatpush1.bf16.msra.mxu1 %v3433_v7  ;;  %v3443_v11 = vld [vmem:[#allocation3 + $0x44] ss:$16 sps:$4 sm:$0xff]   ;;  %v3445_v13 = vld [vmem:[#allocation3 + $0x40] ss:$16 sps:$4 sm:$0xff]   ;;  %v3428_v21 = vld [vmem:[%s4386_s0 + $0x8] sm:$0xff]  }
  0x2c   :  { %3390 = vmatpush3.bf16.msra.mxu0 %v3420_v1  ;;  %455 = vmatprep.subr.bf16.mxu1 %v3437_v8  ;;  %v3449_v14 = vld [vmem:[#allocation3 + $0x64] ss:$16 sps:$4 sm:$0xff]   ;;  %v3451_v16 = vld [vmem:[#allocation3 + $0x60] ss:$16 sps:$4 sm:$0xff]   ;;  %v3434_v23 = vld [vmem:[#allocation3 + $0x8] ss:$16 sps:$4 sm:$0xff]  }
  0x2d   :  { %3391 = vmatprep.subr.bf16.mxu0 %v3421_v2  ;;  %v3455_v17 = vld [vmem:[#allocation3 + $0x84] ss:$16 sps:$4 sm:$0xff]   ;;  %v3457_v19 = vld [vmem:[#allocation3 + $0x80] ss:$16 sps:$4 sm:$0xff]   ;;  %v3442_v24 = vld [vmem:[#allocation3 + $0x2c] ss:$16 sps:$4 sm:$0xff]  }
  0x2e   :  { %v3461_v20 = vld [vmem:[#allocation3 + $0xa4] ss:$16 sps:$4 sm:$0xff]   ;;  %v3463_v25 = vld [vmem:[#allocation3 + $0xa0] ss:$16 sps:$4 sm:$0xff]   ;;  %v3440_v26 = vld [vmem:[#allocation3 + $0x28] ss:$16 sps:$4 sm:$0xff]  }
  0x2f   :  { %456 = vmatpush1.bf16.msra.mxu1 %v3439_v9  ;;  %v3429_v22 = vld [vmem:[%s4386_s0 + $0x10] sm:$0xff]   ;;  %v3448_v27 = vld [vmem:[#allocation3 + $0x4c] ss:$16 sps:$4 sm:$0xff]   ;;  %v3446_v29 = vld [vmem:[#allocation3 + $0x48] ss:$16 sps:$4 sm:$0xff]  }
  0x30   :  { %3392 = vmatpush3.bf16.msra.mxu0 %v3421_v2  ;;  %457 = vmatprep.subr.bf16.mxu1 %v3443_v11  ;;  %v3430_v28 = vld [vmem:[%s4386_s0 + $0x18] sm:$0xff]   ;;  %v3467_v36 = vld [vmem:[#allocation3 + $0xc4] ss:$16 sps:$4 sm:$0xff]   ;;  %v3469_v38 = vld [vmem:[#allocation3 + $0xc0] ss:$16 sps:$4 sm:$0xff]  }
  0x31   :  { %3393 = vmatprep.subr.bf16.mxu0 %v3422_v3  ;;  %v3454_v30 = vld [vmem:[#allocation3 + $0x6c] ss:$16 sps:$4 sm:$0xff]   ;;  %v3452_v31 = vld [vmem:[#allocation3 + $0x68] ss:$16 sps:$4 sm:$0xff]   ;;  %v3473_v40 = vld [vmem:[#allocation3 + $0xe4] ss:$16 sps:$4 sm:$0xff]  }
  0x32   :  { %v3460_v32 = vld [vmem:[#allocation3 + $0x8c] ss:$16 sps:$4 sm:$0xff]   ;;  %v3458_v33 = vld [vmem:[#allocation3 + $0x88] ss:$16 sps:$4 sm:$0xff]   ;;  %v3475_v42 = vld [vmem:[#allocation3 + $0xe0] ss:$16 sps:$4 sm:$0xff]  }
  0x33   :  { %458 = vmatpush1.bf16.msra.mxu1 %v3445_v13  ;;  %v3466_v34 = vld [vmem:[#allocation3 + $0xac] ss:$16 sps:$4 sm:$0xff]   ;;  %v3464_v35 = vld [vmem:[#allocation3 + $0xa8] ss:$16 sps:$4 sm:$0xff]   ;;  %v3840_v44 = vld [vmem:[#allocation6 + $0x4] ss:$16 sps:$4 sm:$0xff]  }
  0x34   :  { %3394 = vmatpush3.bf16.msra.mxu0 %v3422_v3  ;;  %459 = vmatprep.subr.bf16.mxu1 %v3449_v14  ;;  %v3472_v37 = vld [vmem:[#allocation3 + $0xcc] ss:$16 sps:$4 sm:$0xff]   ;;  %v3470_v39 = vld [vmem:[#allocation3 + $0xc8] ss:$16 sps:$4 sm:$0xff]   ;;  %v3074_v47 = vld [vmem:[%s4388_s2] ss:$0 sm:$0xff] }
  0x35   :  { %3395 = vmatprep.subr.bf16.mxu0 %v3423_v5  ;;  %v3478_v41 = vld [vmem:[#allocation3 + $0xec] ss:$16 sps:$4 sm:$0xff]   ;;  %v3476_v43 = vld [vmem:[#allocation3 + $0xe8] ss:$16 sps:$4 sm:$0xff]   ;;  %v3851_v61 = vld [vmem:[#allocation6] ss:$16 sps:$4 sm:$0xff]  }
  0x36   :  { %v3844_v46 = vld [vmem:[#allocation6 + $0xc] ss:$16 sps:$4 sm:$0xff]   ;;  %v3853_v62 = vld [vmem:[#allocation6 + $0x8] ss:$16 sps:$4 sm:$0xff]   ;;  %v3855_v1 = vld [vmem:[#allocation6 + $0x24] ss:$16 sps:$4 sm:$0xff]  }
  0x37   :  { %460 = vmatpush1.bf16.msra.mxu1 %v3451_v16  ;;  %v3857_v2 = vld [vmem:[#allocation6 + $0x2c] ss:$16 sps:$4 sm:$0xff]   ;;  %v3861_v8 = vld [vmem:[#allocation6 + $0x20] ss:$16 sps:$4 sm:$0xff]   ;;  %v3863_v9 = vld [vmem:[#allocation6 + $0x28] ss:$16 sps:$4 sm:$0xff]  }
  0x38   :  { %3396 = vmatpush3.bf16.msra.mxu0 %v3423_v5  ;;  %461 = vmatprep.subr.bf16.mxu1 %v3455_v17  ;;  %v3867_v14 = vld [vmem:[#allocation6 + $0x44] ss:$16 sps:$4 sm:$0xff]  }
  0x39   :  { %3397 = vmatprep.subr.bf16.mxu0 %v3424_v10 }
  0x3b   :  { %462 = vmatpush1.bf16.msra.mxu1 %v3457_v19  ;;  %v3875_v19 = vld [vmem:[#allocation6 + $0x40] ss:$16 sps:$4 sm:$0xff]  }
  0x3c   :  { %3398 = vmatpush3.bf16.msra.mxu0 %v3424_v10  ;;  %463 = vmatprep.subr.bf16.mxu1 %v3461_v20  ;;  %v3877_v20 = vld [vmem:[#allocation6 + $0x48] ss:$16 sps:$4 sm:$0xff]  }
  0x3d   :  { %3399 = vmatprep.subr.bf16.mxu0 %v3425_v12 }
  0x3f   :  { %464 = vmatpush1.bf16.msra.mxu1 %v3463_v25  ;;  %v3889_v25 = vld [vmem:[#allocation6 + $0x68] ss:$16 sps:$4 sm:$0xff]  }
  0x40   :  { %3400 = vmatpush3.bf16.msra.mxu0 %v3425_v12  ;;  %465 = vmatprep.subr.bf16.mxu1 %v3467_v36  ;;  %v3927_v36 = vld [vmem:[#allocation6 + $0xc0] ss:$16 sps:$4 sm:$0xff]  }
  0x41   :  { %3401 = vmatprep.subr.bf16.mxu0 %v3426_v15 }
  0x43   :  { %466 = vmatpush1.bf16.msra.mxu1 %v3469_v38  ;;  %v3933_v38 = vld [vmem:[#allocation6 + $0xe4] ss:$16 sps:$4 sm:$0xff]  }
  0x44   :  { %3402 = vmatpush3.bf16.msra.mxu0 %v3426_v15  ;;  %467 = vmatprep.subr.bf16.mxu1 %v3473_v40  ;;  %v3869_v15 = vld [vmem:[#allocation6 + $0x4c] ss:$16 sps:$4 sm:$0xff]   ;;  %v3939_v40 = vld [vmem:[#allocation6 + $0xe0] ss:$16 sps:$4 sm:$0xff]  }
  0x45   :  { %526 = vmatprep.subr.bf16.mxu0 %v3436_v18 }
  0x47   :  { %3404 = vmatmul.mubr.bf16.vlgmr.msra.gmra.mrb[0].mxu0 %v3428_v21  ;;  %468 = vmatpush1.bf16.msra.mxu1 %v3475_v42  ;;  %v631_v42 = vld [vmem:[%s4392_s6] sm:$0xff] }
  0x48   :  { %3407 = vmatprep.mubr.bf16.mxu0 %v3429_v22  ;;  %527 = vmatpush1.bf16.msra.mxu0 %v3434_v23  ;;  %v3881_v22 = vld [vmem:[#allocation6 + $0x64] ss:$16 sps:$4 sm:$0xff]   ;;  %v3883_v23 = vld [vmem:[#allocation6 + $0x6c] ss:$16 sps:$4 sm:$0xff]  }
  0x49   :  { %528 = vmatprep.subr.bf16.mxu0 %v3442_v24  ;;  %830 = vmatprep.subr.bf16.mxu1 %v3840_v44  ;;  %v3887_v24 = vld [vmem:[#allocation6 + $0x60] ss:$16 sps:$4 sm:$0xff]  }
  0x4c   :  { %529 = vmatpush1.bf16.msra.mxu0 %v3440_v26  ;;  %v3893_v26 = vld [vmem:[#allocation6 + $0x84] ss:$16 sps:$4 sm:$0xff]  }
  0x4d   :  { %530 = vmatprep.subr.bf16.mxu0 %v3448_v27  ;;  %v3895_v27 = vld [vmem:[#allocation6 + $0x8c] ss:$16 sps:$4 sm:$0xff]  }
  0x4f   :  { %3408 = vmatmul.mubr.bf16.gmra.mrb[4].mxu0 %v3430_v28  ;;  %v3901_v28 = vld [vmem:[#allocation6 + $0x80] ss:$16 sps:$4 sm:$0xff]  }
  0x50   :  { %531 = vmatpush1.bf16.msra.mxu0 %v3446_v29  ;;  %558 = vmatprep.mubr.bf16.mxu0 %v4395_v45  ;;  %v3903_v29 = vld [vmem:[#allocation6 + $0x88] ss:$16 sps:$4 sm:$0xff]  }
  0x51   :  { %532 = vmatprep.subr.bf16.mxu0 %v3454_v30  ;;  %v3907_v30 = vld [vmem:[#allocation6 + $0xa4] ss:$16 sps:$4 sm:$0xff]  }
  0x54   :  { %533 = vmatpush1.bf16.msra.mxu0 %v3452_v31  ;;  %v3909_v31 = vld [vmem:[#allocation6 + $0xac] ss:$16 sps:$4 sm:$0xff]  }
  0x55   :  { %534 = vmatprep.subr.bf16.mxu0 %v3460_v32  ;;  %v3913_v32 = vld [vmem:[#allocation6 + $0xa0] ss:$16 sps:$4 sm:$0xff]  }
  0x58   :  { %535 = vmatpush1.bf16.msra.mxu0 %v3458_v33  ;;  %v3915_v33 = vld [vmem:[#allocation6 + $0xa8] ss:$16 sps:$4 sm:$0xff]  }
  0x59   :  { %536 = vmatprep.subr.bf16.mxu0 %v3466_v34  ;;  %v3919_v34 = vld [vmem:[#allocation6 + $0xc4] ss:$16 sps:$4 sm:$0xff]  }
  0x5c   :  { %537 = vmatpush1.bf16.msra.mxu0 %v3464_v35  ;;  %v3921_v35 = vld [vmem:[#allocation6 + $0xcc] ss:$16 sps:$4 sm:$0xff]  }
  0x5d   :  { %538 = vmatprep.subr.bf16.mxu0 %v3472_v37  ;;  %v3929_v37 = vld [vmem:[#allocation6 + $0xc8] ss:$16 sps:$4 sm:$0xff]  }
  0x60   :  { %539 = vmatpush1.bf16.msra.mxu0 %v3470_v39  ;;  %v3935_v39 = vld [vmem:[#allocation6 + $0xec] ss:$16 sps:$4 sm:$0xff]  }
  0x61   :  { %540 = vmatprep.subr.bf16.mxu0 %v3478_v41  ;;  %v3941_v41 = vld [vmem:[#allocation6 + $0xe8] ss:$16 sps:$4 sm:$0xff]  }
  0x64   :  { %541 = vmatpush1.bf16.msra.mxu0 %v3476_v43  ;;  %v637_v43 = vpack.c.bf16 %v631_v42, %v631_v42 }
  0x65   :  { %871 = vmatprep.subr.bf16.mxu0 %v3844_v46 }
 0x11a   :  { %v3405_v48 = vpop.f32.mrb[0].mxu0 }
 0x11b   :  { %v205_v49 = vadd.f32 %v3405_v48, %v3074_v47  ;;  %v196_v50 = vpop.f32.mrb[1].mxu0 }
 0x11c   :  { %v197_v51 = vadd.f32 %v3074_v47, %v196_v50  ;;  %v3406_v52 = vpop.f32.mrb[2].mxu0 }
 0x11d   :  { %v208_v53 = vadd.f32 %v3406_v52, %v3074_v47  ;;  %v199_v54 = vpop.f32.mrb[3].mxu0  ;;  %v229_v56 = vmax.f32 %v205_v49, 0.0 }
 0x11e   :  { %v200_v55 = vadd.f32 %v3074_v47, %v199_v54  ;;  %v227_v58 = vmax.f32 %v197_v51, 0.0  ;;  %v271_v51 = vld [vmem:[%s4391_s5] sm:$0xf] }
 0x11f   :  { %v230_v57 = vmax.f32 %v208_v53, 0.0 }
 0x120   :  { %v228_v59 = vmax.f32 %v200_v55, 0.0 }
 0x121   :  { %v236_v60 = vpack.c.bf16 %v230_v57, %v229_v56 }
 0x122   :  { %v235_v63 = vpack.c.bf16 %v228_v59, %v227_v58  ;;  %v3409_v0 = vpop.f32.mrb[4].mxu0 }
 0x123   :  { %v221_v3 = vadd.f32 %v3409_v0, %v3074_v47  ;;  %v212_v4 = vpop.f32.mrb[5].mxu0 }
 0x124   :  { %486 = vmatmul.mubr.bf16.vlgmr.msra.gmra.mrb[0].mxu1 %v235_v63  ;;  %559 = vmatmul.mubr.bf16.vlgmr.msra.gmra.mrb[8].mxu0 %v235_v63  ;;  %v213_v5 = vadd.f32 %v3074_v47, %v212_v4  ;;  %v3410_v6 = vpop.f32.mrb[6].mxu0 }
 0x125   :  { %831 = vmatpush1.bf16.msra.mxu1 %v3851_v61  ;;  %872 = vmatpush1.bf16.msra.mxu0 %v3853_v62  ;;  %v233_v7 = vmax.f32 %v221_v3, 0.0  ;;  %v224_v10 = vadd.f32 %v3410_v6, %v3074_v47  ;;  %v215_v11 = vpop.f32.mrb[7].mxu0 }
 0x126   :  { %832 = vmatprep.subr.bf16.mxu1 %v3855_v1  ;;  %v231_v12 = vmax.f32 %v213_v5, 0.0  ;;  %873 = vmatprep.subr.bf16.mxu0 %v3857_v2  ;;  %v216_v13 = vadd.f32 %v3074_v47, %v215_v11  ;;  %v273_v47 = vlaneseq }
 0x127   :  { %v234_v16 = vmax.f32 %v224_v10, 0.0  ;;  %495 = vmatprep.mubr.bf16.mxu1 %v4395_v45  ;;  %568 = vmatprep.mubr.bf16.mxu0 %v4395_v45 }
 0x128   :  { %v232_v17 = vmax.f32 %v216_v13, 0.0  ;;  %v274_v48 = vshrl.u32 %v273_v47, 7 }
 0x129   :  { %833 = vmatpush1.bf16.msra.mxu1 %v3861_v8  ;;  %v238_v18 = vpack.c.bf16 %v234_v16, %v233_v7  ;;  %874 = vmatpush1.bf16.msra.mxu0 %v3863_v9 }
 0x12a   :  { %v237_v21 = vpack.c.bf16 %v232_v17, %v231_v12  ;;  %834 = vmatprep.subr.bf16.mxu1 %v3867_v14  ;;  %875 = vmatprep.subr.bf16.mxu0 %v3869_v15  ;;  %v275_v49 = vsub.s32 0, %v274_v48  ;;  %v283_v50 = vsub.s32 2, %v274_v48  ;;  %v279_v52 = vsub.s32 1, %v274_v48 }
 0x12b   :  { %v287_v53 = vsub.s32 3, %v274_v48 }
 0x12c   :  { %496 = vmatmul.mubr.bf16.gmra.mrb[4].mxu1 %v236_v60  ;;  %569 = vmatmul.mubr.bf16.gmra.mrb[12].mxu0 %v236_v60  ;;  %v276_v56 = vrot.slane %v271_v51, %v275_v49  ;;  %v284_v57 = vrot.slane %v271_v51, %v283_v50  ;;  %v280_v60 = vrot.slane %v271_v51, %v279_v52 }
 0x12d   :  { %835 = vmatpush1.bf16.msra.mxu1 %v3875_v19  ;;  %876 = vmatpush1.bf16.msra.mxu0 %v3877_v20  ;;  %v288_v63 = vrot.slane %v271_v51, %v287_v53 }
 0x12e   :  { %836 = vmatprep.subr.bf16.mxu1 %v3881_v22  ;;  %877 = vmatprep.subr.bf16.mxu0 %v3883_v23 }
 0x12f   :  { %505 = vmatprep.mubr.bf16.mxu1 %v4395_v45  ;;  %578 = vmatprep.mubr.bf16.mxu0 %v4395_v45 }
 0x131   :  { %837 = vmatpush1.bf16.msra.mxu1 %v3887_v24  ;;  %878 = vmatpush1.bf16.msra.mxu0 %v3889_v25 }
 0x132   :  { %838 = vmatprep.subr.bf16.mxu1 %v3893_v26  ;;  %879 = vmatprep.subr.bf16.mxu0 %v3895_v27 }
 0x134   :  { %506 = vmatmul.mubr.bf16.gmra.mrb[8].mxu1 %v237_v21  ;;  %579 = vmatmul.mubr.bf16.gmra.mrb[16].mxu0 %v237_v21 }
 0x135   :  { %839 = vmatpush1.bf16.msra.mxu1 %v3901_v28  ;;  %880 = vmatpush1.bf16.msra.mxu0 %v3903_v29 }
 0x136   :  { %840 = vmatprep.subr.bf16.mxu1 %v3907_v30  ;;  %881 = vmatprep.subr.bf16.mxu0 %v3909_v31 }
 0x137   :  { %515 = vmatprep.mubr.bf16.mxu1 %v4395_v45  ;;  %588 = vmatprep.mubr.bf16.mxu0 %v4395_v45 }
 0x139   :  { %841 = vmatpush1.bf16.msra.mxu1 %v3913_v32  ;;  %882 = vmatpush1.bf16.msra.mxu0 %v3915_v33 }
 0x13a   :  { %842 = vmatprep.subr.bf16.mxu1 %v3919_v34  ;;  %883 = vmatprep.subr.bf16.mxu0 %v3921_v35 }
 0x13c   :  { %516 = vmatmul.mubr.bf16.gmra.mrb[12].mxu1 %v238_v18  ;;  %589 = vmatmul.mubr.bf16.gmra.mrb[20].mxu0 %v238_v18 }
 0x13d   :  { %843 = vmatpush1.bf16.msra.mxu1 %v3927_v36  ;;  %884 = vmatpush1.bf16.msra.mxu0 %v3929_v37 }
 0x13e   :  { %844 = vmatprep.subr.bf16.mxu1 %v3933_v38  ;;  %885 = vmatprep.subr.bf16.mxu0 %v3935_v39 }
 0x13f   :  { %862 = vmatprep.mubr.bf16.mxu1 %v4395_v45  ;;  %903 = vmatprep.mubr.bf16.mxu0 %v4395_v45 }
 0x141   :  { %845 = vmatpush1.bf16.msra.mxu1 %v3939_v40  ;;  %886 = vmatpush1.bf16.msra.mxu0 %v3941_v41 }
 0x142   :  { %1132 = vmatprep.subr.bf16.mxu1 %v3840_v44  ;;  %1173 = vmatprep.subr.bf16.mxu0 %v3844_v46 }
 0x144   :  { %863 = vmatmul.mubr.bf16.vlgmr.msra.gmra.mrb[16].mxu1 %v637_v43  ;;  %904 = vmatmul.mubr.bf16.vlgmr.msra.gmra.mrb[24].mxu0 %v637_v43 }
 0x145   :  { %1133 = vmatpush1.bf16.msra.mxu1 %v3851_v61  ;;  %1174 = vmatpush1.bf16.msra.mxu0 %v3853_v62 }
 0x146   :  { %1134 = vmatprep.subr.bf16.mxu1 %v3855_v1  ;;  %1175 = vmatprep.subr.bf16.mxu0 %v3857_v2 }
 0x147   :  { %1164 = vmatprep.mubr.bf16.mxu1 %v4395_v45  ;;  %1205 = vmatprep.mubr.bf16.mxu0 %v4395_v45 }
 0x149   :  { %1135 = vmatpush1.bf16.msra.mxu1 %v3861_v8  ;;  %1176 = vmatpush1.bf16.msra.mxu0 %v3863_v9 }
 0x14a   :  { %1136 = vmatprep.subr.bf16.mxu1 %v3867_v14  ;;  %1177 = vmatprep.subr.bf16.mxu0 %v3869_v15 }
 0x14d   :  { %1137 = vmatpush1.bf16.msra.mxu1 %v3875_v19  ;;  %1178 = vmatpush1.bf16.msra.mxu0 %v3877_v20 }
 0x14e   :  { %1138 = vmatprep.subr.bf16.mxu1 %v3881_v22  ;;  %1179 = vmatprep.subr.bf16.mxu0 %v3883_v23 }
 0x151   :  { %1139 = vmatpush1.bf16.msra.mxu1 %v3887_v24  ;;  %1180 = vmatpush1.bf16.msra.mxu0 %v3889_v25 }
 0x152   :  { %1140 = vmatprep.subr.bf16.mxu1 %v3893_v26  ;;  %1181 = vmatprep.subr.bf16.mxu0 %v3895_v27 }
 0x155   :  { %1141 = vmatpush1.bf16.msra.mxu1 %v3901_v28  ;;  %1182 = vmatpush1.bf16.msra.mxu0 %v3903_v29 }
 0x156   :  { %1142 = vmatprep.subr.bf16.mxu1 %v3907_v30  ;;  %1183 = vmatprep.subr.bf16.mxu0 %v3909_v31 }
 0x159   :  { %1143 = vmatpush1.bf16.msra.mxu1 %v3913_v32  ;;  %1184 = vmatpush1.bf16.msra.mxu0 %v3915_v33 }
 0x15a   :  { %1144 = vmatprep.subr.bf16.mxu1 %v3919_v34  ;;  %1185 = vmatprep.subr.bf16.mxu0 %v3921_v35 }
 0x15d   :  { %1145 = vmatpush1.bf16.msra.mxu1 %v3927_v36  ;;  %1186 = vmatpush1.bf16.msra.mxu0 %v3929_v37 }
 0x15e   :  { %1146 = vmatprep.subr.bf16.mxu1 %v3933_v38  ;;  %1187 = vmatprep.subr.bf16.mxu0 %v3935_v39 }
 0x161   :  { %1147 = vmatpush1.bf16.msra.mxu1 %v3939_v40  ;;  %1188 = vmatpush1.bf16.msra.mxu0 %v3941_v41 }
 0x162   :  { %1435 = vmatprep.subr.bf16.mxu1 %v3840_v44  ;;  %1476 = vmatprep.subr.bf16.mxu0 %v3844_v46 }
 0x1f7   :  { %v3991_v54 = vpop.f32.mrb[0].mxu1  ;;  %v3993_v55 = vpop.f32.mrb[8].mxu0 }
 0x1f8   :  { %v489_v58 = vpop.f32.mrb[1].mxu1  ;;  %v562_v59 = vpop.f32.mrb[9].mxu0 }
 0x1f9   :  { %v491_v0 = vpop.f32.mrb[2].mxu1  ;;  %v564_v3 = vpop.f32.mrb[10].mxu0 }
 0x1fa   :  { %v3995_v4 = vadd.f32 %v491_v0, %v276_v56  ;;  %v3997_v5 = vadd.f32 %v564_v3, %v284_v57  ;;  %v493_v6 = vpop.f32.mrb[3].mxu1  ;;  %v566_v7 = vpop.f32.mrb[11].mxu0 }
 0x1fb   :  { %v3999_v10 = vadd.f32 %v493_v6, %v280_v60  ;;  %v4001_v11 = vadd.f32 %v566_v7, %v288_v63 }
 0x1ff   :  { %v497_v12 = vpop.f32.mrb[4].mxu1  ;;  %v570_v13 = vpop.f32.mrb[12].mxu0 }
 0x200   :  { %v4003_v16 = vadd.f32 %v497_v12, %v276_v56  ;;  %v4005_v17 = vadd.f32 %v570_v13, %v284_v57  ;;  %v499_v18 = vpop.f32.mrb[5].mxu1  ;;  %v572_v21 = vpop.f32.mrb[13].mxu0 }
 0x201   :  { %v4007_v42 = vadd.f32 %v499_v18, %v280_v60  ;;  %v4009_v43 = vadd.f32 %v572_v21, %v288_v63  ;;  %v501_v47 = vpop.f32.mrb[6].mxu1  ;;  %v574_v48 = vpop.f32.mrb[14].mxu0 }
 0x202   :  { %v4011_v49 = vadd.f32 %v501_v47, %v276_v56  ;;  %v4013_v50 = vadd.f32 %v574_v48, %v284_v57  ;;  %v503_v51 = vpop.f32.mrb[7].mxu1  ;;  %v576_v52 = vpop.f32.mrb[15].mxu0 }
 0x203   :  { %4397 = vst [vmem:[#allocation12_spill] sm:$0xff] %v4007_v42  ;;  %4398 = vst [vmem:[#allocation13_spill] sm:$0xff] %v4009_v43  ;;  %v4015_v53 = vadd.f32 %v503_v51, %v280_v60  ;;  %v4017_v0 = vadd.f32 %v576_v52, %v288_v63 }
 0x204   :  { %4399 = vst [vmem:[#allocation14_spill] sm:$0xff] %v4011_v49  ;;  %4400 = vst [vmem:[#allocation15_spill] sm:$0xff] %v4013_v50 }
 0x205   :  { %4401 = vst [vmem:[#allocation16_spill] sm:$0xff] %v4015_v53  ;;  %4402 = vst [vmem:[#allocation17_spill] sm:$0xff] %v4017_v0 }
 0x207   :  { %v507_v3 = vpop.f32.mrb[8].mxu1  ;;  %v580_v6 = vpop.f32.mrb[16].mxu0 }
 0x208   :  { %v4019_v7 = vadd.f32 %v507_v3, %v276_v56  ;;  %v4021_v12 = vadd.f32 %v580_v6, %v284_v57  ;;  %v509_v13 = vpop.f32.mrb[9].mxu1  ;;  %v582_v18 = vpop.f32.mrb[17].mxu0 }
 0x209   :  { %v4023_v21 = vadd.f32 %v509_v13, %v280_v60  ;;  %v4025_v47 = vadd.f32 %v582_v18, %v288_v63  ;;  %v511_v48 = vpop.f32.mrb[10].mxu1  ;;  %v584_v45 = vpop.f32.mrb[18].mxu0 }
 0x20a   :  { %4403 = vst [vmem:[#allocation18_spill] sm:$0xff] %v4019_v7  ;;  %4404 = vst [vmem:[#allocation19_spill] sm:$0xff] %v4021_v12  ;;  %v4027_v50 = vadd.f32 %v511_v48, %v276_v56  ;;  %v4029_v51 = vadd.f32 %v584_v45, %v284_v57  ;;  %v513_v52 = vpop.f32.mrb[11].mxu1  ;;  %v586_v0 = vpop.f32.mrb[19].mxu0 }
 0x20b   :  { %4405 = vst [vmem:[#allocation20_spill] sm:$0xff] %v4023_v21  ;;  %4406 = vst [vmem:[#allocation21_spill] sm:$0xff] %v4025_v47  ;;  %v4031_v53 = vadd.f32 %v513_v52, %v280_v60  ;;  %v4033_v3 = vadd.f32 %v586_v0, %v288_v63 }
 0x20c   :  { %4407 = vst [vmem:[#allocation22_spill] sm:$0xff] %v4027_v50  ;;  %4408 = vst [vmem:[#allocation23_spill] sm:$0xff] %v4029_v51 }
 0x20d   :  { %4409 = vst [vmem:[#allocation24_spill] sm:$0xff] %v4031_v53  ;;  %4410 = vst [vmem:[#allocation25_spill] sm:$0xff] %v4033_v3 }
 0x20f   :  { %v517_v6 = vpop.f32.mrb[12].mxu1  ;;  %v590_v12 = vpop.f32.mrb[20].mxu0 }
 0x210   :  { %v4035_v7 = vadd.f32 %v517_v6, %v276_v56  ;;  %v4037_v13 = vadd.f32 %v590_v12, %v284_v57  ;;  %v519_v18 = vpop.f32.mrb[13].mxu1  ;;  %v592_v47 = vpop.f32.mrb[21].mxu0  ;;  %v488_v12 = vadd.f32 %v3991_v54, %v276_v56 }
 0x211   :  { %v4039_v21 = vadd.f32 %v519_v18, %v280_v60  ;;  %v4041_v48 = vadd.f32 %v592_v47, %v288_v63  ;;  %v521_v45 = vpop.f32.mrb[14].mxu1  ;;  %v594_v51 = vpop.f32.mrb[22].mxu0  ;;  %v490_v18 = vadd.f32 %v489_v58, %v280_v60 }
 0x212   :  { %4411 = vst [vmem:[#allocation26_spill] sm:$0xff] %v4035_v7  ;;  %4412 = vst [vmem:[#allocation27_spill] sm:$0xff] %v4037_v13  ;;  %v4043_v50 = vadd.f32 %v521_v45, %v276_v56  ;;  %v4045_v52 = vadd.f32 %v594_v51, %v284_v57  ;;  %v523_v0 = vpop.f32.mrb[15].mxu1  ;;  %v596_v3 = vpop.f32.mrb[23].mxu0  ;;  %v561_v13 = vadd.f32 %v3993_v55, %v284_v57 }
 0x213   :  { %4413 = vst [vmem:[#allocation28_spill] sm:$0xff] %v4039_v21  ;;  %4414 = vst [vmem:[#allocation29_spill] sm:$0xff] %v4041_v48  ;;  %v4047_v53 = vadd.f32 %v523_v0, %v280_v60  ;;  %v4049_v6 = vadd.f32 %v596_v3, %v288_v63  ;;  %v563_v21 = vadd.f32 %v562_v59, %v288_v63  ;;  %v632_v63 = vld [vmem:[%s4393_s7] sm:$0xff]  ;;  %s3732_s7 = smov [#allocation8]  }
 0x214   :  { %4415 = vst [vmem:[#allocation30_spill] sm:$0xff] %v4043_v50  ;;  %4416 = vst [vmem:[#allocation31_spill] sm:$0xff] %v4045_v52  ;;  %s3061_s11 = sshll.u32 %s3732_s7, 4  ;;  %s3062_s11 = int_to_ptr.vmem [resolvable:$true] %s3061_s11 }
 0x215   :  { %4417 = vst [vmem:[#allocation32_spill] sm:$0xff] %v4047_v53  ;;  %4418 = vst [vmem:[#allocation33_spill] sm:$0xff] %v4049_v6  ;;  %s3699_s12 = scalar_lea.vmem %s3062_s11, 1024  ;;  %p3704_p3 = scmp.lt.s32.totalorder %s3062_s11, %s3062_s11 }
 0x216   :  { %p3700_p2 = scmp.ne.s32.totalorder %s3062_s11, %s3699_s12  ;;  %p3705_p4 = scmp.lt.s32.totalorder %s3699_s12, %s3699_s12 }
 0x217   :  { %v864_v47 = vpop.f32.mrb[16].mxu1  ;;  %v905_v48 = vpop.f32.mrb[24].mxu0 }
 0x218   :  { %v912_v7 = vadd.f32 %v864_v47, %v488_v12  ;;  %v914_v49 = vadd.f32 %v905_v48, %v561_v13  ;;  %v866_v45 = vpop.f32.mrb[17].mxu1  ;;  %v907_v50 = vpop.f32.mrb[25].mxu0  ;;  %p3706_p5 = por %p3705_p4, %p3704_p3 }
 0x219   :  { %v913_v51 = vadd.f32 %v866_v45, %v490_v18  ;;  %v915_v52 = vadd.f32 %v907_v50, %v563_v21  ;;  %v868_v43 = vpop.f32.mrb[18].mxu1  ;;  %v909_v42 = vpop.f32.mrb[26].mxu0 }
 0x21a   :  { %v916_v0 = vmul.f32 0.5, %v912_v7  ;;  %v869_v53 = vpop.f32.mrb[19].mxu1  ;;  %v910_v3 = vpop.f32.mrb[27].mxu0  ;;  %v918_v54 = vmul.f32 0.5, %v914_v49  ;;  %p3707_p6 = pnand %p3706_p5, %p3700_p2 }
 0x21b   :  { %v917_v6 = vmul.f32 0.5, %v913_v51 }
 0x21c   :  { %3575 = vtanh.f32 %v916_v0 }
 0x21d   :  { %3577 = vtanh.f32 %v917_v6  ;;  %v4419_v6 = vmov 0  }
 0x21e   :  { %3579 = vtanh.f32 %v915_v52 }
 0x21f   :  { %3581 = vtanh.f32 %v918_v54 }
 0x226   :  { %v3576_v55 = vpop.eup %3575 }
 0x227   :  { %v922_v56 = vmul.f32 0.5, %v3576_v55  ;;  %v3578_v57 = vpop.eup %3577 }
 0x228   :  { %v923_v59 = vmul.f32 0.5, %v3578_v57  ;;  %v3580_v60 = vpop.eup %3579 }
 0x229   :  { %v925_v58 = vadd.f32 0.5, %v922_v56  ;;  %v3582_v7 = vpop.eup %3581 }
 0x22a   :  { %v926_v42 = vadd.f32 0.5, %v923_v59  ;;  %v924_v49 = vmul.f32 0.5, %v3582_v7 }
 0x22b   :  { %v930_v43 = vmul.f32 %v3580_v60, %v925_v58 }
 0x22c   :  { %v929_v50 = vmul.f32 %v926_v42, %v632_v63  ;;  %v927_v21 = vadd.f32 0.5, %v924_v49 }
 0x22e   :  { %v4056_v53 = vadd.f32 %v930_v43, %v929_v50 }
 0x230   :  { %3583 = vtanh.f32 %v4056_v53 }
 0x23a   :  { %v3584_v13 = vpop.eup %3583 }
 0x23b   :  { %v933_v48 = vmul.f32 %v3584_v13, %v927_v21 }
 0x23d   :  { %934 = vst [vmem:[#allocation8] sm:$0xff] %v933_v48  ;;  %v939_v52 = vpack.c.bf16 %v933_v48, %v933_v48 }
 0x23f   :  { %1165 = vmatmul.mubr.bf16.vlgmr.msra.gmra.mrb[20].mxu1 %v939_v52  ;;  %1206 = vmatmul.mubr.bf16.vlgmr.msra.gmra.mrb[28].mxu0 %v939_v52 }
 0x240   :  { %1436 = vmatpush1.bf16.msra.mxu1 %v3851_v61  ;;  %1477 = vmatpush1.bf16.msra.mxu0 %v3853_v62 }
 0x241   :  { %1437 = vmatprep.subr.bf16.mxu1 %v3855_v1  ;;  %1478 = vmatprep.subr.bf16.mxu0 %v3857_v2 }
 0x242   :  { %1467 = vmatprep.mubr.bf16.mxu1 %v4419_v6  ;;  %1508 = vmatprep.mubr.bf16.mxu0 %v4419_v6 }
 0x244   :  { %1438 = vmatpush1.bf16.msra.mxu1 %v3861_v8  ;;  %1479 = vmatpush1.bf16.msra.mxu0 %v3863_v9 }
 0x245   :  { %1439 = vmatprep.subr.bf16.mxu1 %v3867_v14  ;;  %1480 = vmatprep.subr.bf16.mxu0 %v3869_v15 }
 0x248   :  { %1440 = vmatpush1.bf16.msra.mxu1 %v3875_v19  ;;  %1481 = vmatpush1.bf16.msra.mxu0 %v3877_v20 }
 0x249   :  { %1441 = vmatprep.subr.bf16.mxu1 %v3881_v22  ;;  %1482 = vmatprep.subr.bf16.mxu0 %v3883_v23 }
 0x24c   :  { %1442 = vmatpush1.bf16.msra.mxu1 %v3887_v24  ;;  %1483 = vmatpush1.bf16.msra.mxu0 %v3889_v25 }
 0x24d   :  { %1443 = vmatprep.subr.bf16.mxu1 %v3893_v26  ;;  %1484 = vmatprep.subr.bf16.mxu0 %v3895_v27 }
 0x250   :  { %1444 = vmatpush1.bf16.msra.mxu1 %v3901_v28  ;;  %1485 = vmatpush1.bf16.msra.mxu0 %v3903_v29 }
 0x251   :  { %1445 = vmatprep.subr.bf16.mxu1 %v3907_v30  ;;  %1486 = vmatprep.subr.bf16.mxu0 %v3909_v31 }
 0x254   :  { %1446 = vmatpush1.bf16.msra.mxu1 %v3913_v32  ;;  %1487 = vmatpush1.bf16.msra.mxu0 %v3915_v33 }
 0x255   :  { %1447 = vmatprep.subr.bf16.mxu1 %v3919_v34  ;;  %1488 = vmatprep.subr.bf16.mxu0 %v3921_v35 }
 0x258   :  { %1448 = vmatpush1.bf16.msra.mxu1 %v3927_v36  ;;  %1489 = vmatpush1.bf16.msra.mxu0 %v3929_v37 }
 0x259   :  { %1449 = vmatprep.subr.bf16.mxu1 %v3933_v38  ;;  %1490 = vmatprep.subr.bf16.mxu0 %v3935_v39 }
 0x25c   :  { %1450 = vmatpush1.bf16.msra.mxu1 %v3939_v40  ;;  %1491 = vmatpush1.bf16.msra.mxu0 %v3941_v41 }
 0x25d   :  { %1738 = vmatprep.subr.bf16.mxu1 %v3840_v44  ;;  %1779 = vmatprep.subr.bf16.mxu0 %v3844_v46 }
 0x312   :  { %v1166_v12 = vpop.f32.mrb[20].mxu1  ;;  %v1207_v18 = vpop.f32.mrb[28].mxu0 }
 0x313   :  { %v1214_v47 = vadd.f32 %v1166_v12, %v3995_v4  ;;  %v1216_v45 = vadd.f32 %v1207_v18, %v3997_v5  ;;  %v1168_v51 = vpop.f32.mrb[21].mxu1  ;;  %v1209_v0 = vpop.f32.mrb[29].mxu0  ;;  %v4143_v18 = vld [vmem:[#allocation6 + $0x4] ss:$16 sps:$4 sm:$0xff]  }
 0x314   :  { %v1215_v3 = vadd.f32 %v1168_v51, %v3999_v10  ;;  %v1217_v54 = vadd.f32 %v1209_v0, %v4001_v11  ;;  %v1170_v55 = vpop.f32.mrb[22].mxu1  ;;  %v1211_v56 = vpop.f32.mrb[30].mxu0  ;;  %v4149_v51 = vld [vmem:[#allocation6 + $0x8] ss:$16 sps:$4 sm:$0xff]   ;;  %v4155_v0 = vld [vmem:[#allocation6 + $0x24] ss:$16 sps:$4 sm:$0xff]  }
 0x315   :  { %v1218_v57 = vmul.f32 0.5, %v1214_v47  ;;  %v1171_v58 = vpop.f32.mrb[23].mxu1  ;;  %v1212_v59 = vpop.f32.mrb[31].mxu0  ;;  %v1220_v46 = vmul.f32 0.5, %v1216_v45  ;;  %v4145_v47 = vld [vmem:[#allocation6 + $0xc] ss:$16 sps:$4 sm:$0xff]  }
 0x316   :  { %v1219_v44 = vmul.f32 0.5, %v1215_v3  ;;  %v4147_v45 = vld [vmem:[#allocation6] ss:$16 sps:$4 sm:$0xff]   ;;  %v4157_v3 = vld [vmem:[#allocation6 + $0x2c] ss:$16 sps:$4 sm:$0xff]  }
 0x317   :  { %3585 = vtanh.f32 %v1218_v57  ;;  %v4161_v55 = vld [vmem:[#allocation6 + $0x28] ss:$16 sps:$4 sm:$0xff]   ;;  %v4167_v56 = vld [vmem:[#allocation6 + $0x44] ss:$16 sps:$4 sm:$0xff]   ;;  %v4169_v57 = vld [vmem:[#allocation6 + $0x4c] ss:$16 sps:$4 sm:$0xff]  }
 0x318   :  { %3587 = vtanh.f32 %v1219_v44  ;;  %v4171_v58 = vld [vmem:[#allocation6 + $0x40] ss:$16 sps:$4 sm:$0xff]   ;;  %v4173_v59 = vld [vmem:[#allocation6 + $0x48] ss:$16 sps:$4 sm:$0xff]   ;;  %v4179_v44 = vld [vmem:[#allocation6 + $0x64] ss:$16 sps:$4 sm:$0xff]  }
 0x319   :  { %3589 = vtanh.f32 %v1217_v54  ;;  %v4159_v54 = vld [vmem:[#allocation6 + $0x20] ss:$16 sps:$4 sm:$0xff]  }
 0x31a   :  { %3591 = vtanh.f32 %v1220_v46  ;;  %v4181_v46 = vld [vmem:[#allocation6 + $0x6c] ss:$16 sps:$4 sm:$0xff]  }
 0x321   :  { %v3586_v60 = vpop.eup %3585 }
 0x322   :  { %v1224_v4 = vmul.f32 0.5, %v3586_v60  ;;  %v3588_v63 = vpop.eup %3587  ;;  %v4183_v60 = vld [vmem:[#allocation6 + $0x60] ss:$16 sps:$4 sm:$0xff]  }
 0x323   :  { %v1225_v42 = vmul.f32 0.5, %v3588_v63  ;;  %v3590_v43 = vpop.eup %3589  ;;  %v4191_v63 = vld [vmem:[#allocation6 + $0x84] ss:$16 sps:$4 sm:$0xff]  }
 0x324   :  { %v1227_v5 = vadd.f32 0.5, %v1224_v4  ;;  %v3592_v49 = vpop.eup %3591  ;;  %v4185_v4 = vld [vmem:[#allocation6 + $0x68] ss:$16 sps:$4 sm:$0xff]  }
 0x325   :  { %v1228_v10 = vadd.f32 0.5, %v1225_v42  ;;  %v1226_v21 = vmul.f32 0.5, %v3592_v49  ;;  %v4195_v42 = vld [vmem:[#allocation6 + $0x80] ss:$16 sps:$4 sm:$0xff]   ;;  %v4211_v49 = vld [vmem:[#allocation6 + $0xc4] ss:$16 sps:$4 sm:$0xff]  }
 0x326   :  { %v1232_v50 = vmul.f32 %v3590_v43, %v1227_v5  ;;  %v4193_v5 = vld [vmem:[#allocation6 + $0x8c] ss:$16 sps:$4 sm:$0xff]   ;;  %v4197_v43 = vld [vmem:[#allocation6 + $0x88] ss:$16 sps:$4 sm:$0xff]  }
 0x327   :  { %v1231_v11 = vmul.f32 %v1228_v10, %v4056_v53  ;;  %v1229_v13 = vadd.f32 0.5, %v1226_v21  ;;  %v4203_v10 = vld [vmem:[#allocation6 + $0xa0] ss:$16 sps:$4 sm:$0xff]   ;;  %v4214_v21 = vld [vmem:[#allocation6 + $0xcc] ss:$16 sps:$4 sm:$0xff]  }
 0x329   :  { %v4098_v7 = vadd.f32 %v1232_v50, %v1231_v11  ;;  %v4205_v50 = vld [vmem:[#allocation6 + $0xa4] ss:$16 sps:$4 sm:$0xff]   ;;  %v4207_v11 = vld [vmem:[#allocation6 + $0xa8] ss:$16 sps:$4 sm:$0xff]  }
 0x32b   :  { %3593 = vtanh.f32 %v4098_v7 }
 0x335   :  { %v3594_v48 = vpop.eup %3593 }
 0x336   :  { %v1235_v52 = vmul.f32 %v3594_v48, %v1229_v13  ;;  %v4219_v13 = vld [vmem:[#allocation6 + $0xc0] ss:$16 sps:$4 sm:$0xff]   ;;  %v4221_v48 = vld [vmem:[#allocation6 + $0xc8] ss:$16 sps:$4 sm:$0xff]  }
 0x338   :  { %1237 = vst [vmem:[#allocation8 + $0x8] sm:$0xff] %v1235_v52  ;;  %v1242_v12 = vpack.c.bf16 %v1235_v52, %v1235_v52  ;;  %v4225_v52 = vld [vmem:[#allocation6 + $0xe4] ss:$16 sps:$4 sm:$0xff]  }
 0x33a   :  { %1468 = vmatmul.mubr.bf16.vlgmr.msra.gmra.mrb[24].mxu1 %v1242_v12  ;;  %1509 = vmatmul.mubr.bf16.vlgmr.msra.gmra.mrb[32].mxu0 %v1242_v12  ;;  %v4227_v12 = vld [vmem:[#allocation6 + $0xec] ss:$16 sps:$4 sm:$0xff]  }
 0x33b   :  { %1739 = vmatpush1.bf16.msra.mxu1 %v3851_v61  ;;  %1780 = vmatpush1.bf16.msra.mxu0 %v3853_v62 }
 0x33c   :  { %1740 = vmatprep.subr.bf16.mxu1 %v3855_v1  ;;  %1781 = vmatprep.subr.bf16.mxu0 %v3857_v2 }
 0x33d   :  { %1770 = vmatprep.mubr.bf16.mxu1 %v4419_v6  ;;  %1811 = vmatprep.mubr.bf16.mxu0 %v4419_v6 }
 0x33f   :  { %1741 = vmatpush1.bf16.msra.mxu1 %v3861_v8  ;;  %1782 = vmatpush1.bf16.msra.mxu0 %v3863_v9 }
 0x340   :  { %1742 = vmatprep.subr.bf16.mxu1 %v3867_v14  ;;  %1783 = vmatprep.subr.bf16.mxu0 %v3869_v15  ;;  %v4420_v14 = vld [vmem:[#allocation12_spill] sm:$0xff] }
 0x343   :  { %1743 = vmatpush1.bf16.msra.mxu1 %v3875_v19  ;;  %1784 = vmatpush1.bf16.msra.mxu0 %v3877_v20  ;;  %v4421_v19 = vld [vmem:[#allocation13_spill] sm:$0xff] }
 0x344   :  { %1744 = vmatprep.subr.bf16.mxu1 %v3881_v22  ;;  %1785 = vmatprep.subr.bf16.mxu0 %v3883_v23 }
 0x347   :  { %1745 = vmatpush1.bf16.msra.mxu1 %v3887_v24  ;;  %1786 = vmatpush1.bf16.msra.mxu0 %v3889_v25 }
 0x348   :  { %1746 = vmatprep.subr.bf16.mxu1 %v3893_v26  ;;  %1787 = vmatprep.subr.bf16.mxu0 %v3895_v27 }
 0x34b   :  { %1747 = vmatpush1.bf16.msra.mxu1 %v3901_v28  ;;  %1788 = vmatpush1.bf16.msra.mxu0 %v3903_v29 }
 0x34c   :  { %1748 = vmatprep.subr.bf16.mxu1 %v3907_v30  ;;  %1789 = vmatprep.subr.bf16.mxu0 %v3909_v31 }
 0x34f   :  { %1749 = vmatpush1.bf16.msra.mxu1 %v3913_v32  ;;  %1790 = vmatpush1.bf16.msra.mxu0 %v3915_v33 }
 0x350   :  { %1750 = vmatprep.subr.bf16.mxu1 %v3919_v34  ;;  %1791 = vmatprep.subr.bf16.mxu0 %v3921_v35 }
 0x353   :  { %1751 = vmatpush1.bf16.msra.mxu1 %v3927_v36  ;;  %1792 = vmatpush1.bf16.msra.mxu0 %v3929_v37 }
 0x354   :  { %1752 = vmatprep.subr.bf16.mxu1 %v3933_v38  ;;  %1793 = vmatprep.subr.bf16.mxu0 %v3935_v39 }
 0x357   :  { %1753 = vmatpush1.bf16.msra.mxu1 %v3939_v40  ;;  %1794 = vmatpush1.bf16.msra.mxu0 %v3941_v41 }
 0x358   :  { %2041 = vmatprep.subr.bf16.mxu1 %v4143_v18  ;;  %2082 = vmatprep.subr.bf16.mxu0 %v4145_v47 }
 0x40d   :  { %v1469_v61 = vpop.f32.mrb[24].mxu1  ;;  %v1510_v62 = vpop.f32.mrb[32].mxu0 }
 0x40e   :  { %v1517_v1 = vadd.f32 %v1469_v61, %v4003_v16  ;;  %v1519_v2 = vadd.f32 %v1510_v62, %v4005_v17  ;;  %v1471_v8 = vpop.f32.mrb[25].mxu1  ;;  %v1512_v9 = vpop.f32.mrb[33].mxu0  ;;  %v4231_v61 = vld [vmem:[#allocation6 + $0xe0] ss:$16 sps:$4 sm:$0xff]   ;;  %v4233_v62 = vld [vmem:[#allocation6 + $0xe8] ss:$16 sps:$4 sm:$0xff]  }
 0x40f   :  { %v1518_v15 = vadd.f32 %v1471_v8, %v4420_v14  ;;  %v1520_v20 = vadd.f32 %v1512_v9, %v4421_v19  ;;  %v1473_v22 = vpop.f32.mrb[26].mxu1  ;;  %v1514_v23 = vpop.f32.mrb[34].mxu0  ;;  %v4422_v8 = vld [vmem:[#allocation14_spill] sm:$0xff]  ;;  %v4423_v14 = vld [vmem:[#allocation15_spill] sm:$0xff] }
 0x410   :  { %v1521_v24 = vmul.f32 0.5, %v1517_v1  ;;  %v1474_v25 = vpop.f32.mrb[27].mxu1  ;;  %v1515_v26 = vpop.f32.mrb[35].mxu0  ;;  %v1523_v28 = vmul.f32 0.5, %v1519_v2  ;;  %v4424_v22 = vld [vmem:[#allocation16_spill] sm:$0xff] }
 0x411   :  { %v1522_v27 = vmul.f32 0.5, %v1518_v15 }
 0x412   :  { %3595 = vtanh.f32 %v1521_v24  ;;  %v4425_v24 = vld [vmem:[#allocation17_spill] sm:$0xff] }
 0x413   :  { %3597 = vtanh.f32 %v1522_v27 }
 0x414   :  { %3599 = vtanh.f32 %v1520_v20 }
 0x415   :  { %3601 = vtanh.f32 %v1523_v28 }
 0x41c   :  { %v3596_v29 = vpop.eup %3595 }
 0x41d   :  { %v1527_v30 = vmul.f32 0.5, %v3596_v29  ;;  %v3598_v31 = vpop.eup %3597 }
 0x41e   :  { %v1528_v33 = vmul.f32 0.5, %v3598_v31  ;;  %v3600_v34 = vpop.eup %3599 }
 0x41f   :  { %v1530_v32 = vadd.f32 0.5, %v1527_v30  ;;  %v3602_v39 = vpop.eup %3601 }
 0x420   :  { %v1531_v35 = vadd.f32 0.5, %v1528_v33  ;;  %v1529_v40 = vmul.f32 0.5, %v3602_v39 }
 0x421   :  { %v1535_v36 = vmul.f32 %v3600_v34, %v1530_v32 }
 0x422   :  { %v1534_v37 = vmul.f32 %v1531_v35, %v4098_v7  ;;  %v1532_v41 = vadd.f32 0.5, %v1529_v40  ;;  %v4209_v7 = vld [vmem:[#allocation6 + $0xac] ss:$16 sps:$4 sm:$0xff]  }
 0x424   :  { %v4138_v38 = vadd.f32 %v1535_v36, %v1534_v37 }
 0x426   :  { %3603 = vtanh.f32 %v4138_v38 }
 0x430   :  { %v3604_v16 = vpop.eup %3603 }
 0x431   :  { %v1538_v17 = vmul.f32 %v3604_v16, %v1532_v41 }
 0x433   :  { %1540 = vst [vmem:[#allocation8 + $0x10] sm:$0xff] %v1538_v17  ;;  %v1545_v53 = vpack.c.bf16 %v1538_v17, %v1538_v17 }
 0x435   :  { %1771 = vmatmul.mubr.bf16.vlgmr.msra.gmra.mrb[28].mxu1 %v1545_v53  ;;  %1812 = vmatmul.mubr.bf16.vlgmr.msra.gmra.mrb[36].mxu0 %v1545_v53 }
 0x436   :  { %2073 = vmatprep.mubr.bf16.mxu1 %v4419_v6  ;;  %2114 = vmatprep.mubr.bf16.mxu0 %v4419_v6 }
 0x437   :  { %2042 = vmatpush1.bf16.msra.mxu1 %v4147_v45  ;;  %2083 = vmatpush1.bf16.msra.mxu0 %v4149_v51 }
 0x438   :  { %2043 = vmatprep.subr.bf16.mxu1 %v4155_v0  ;;  %2084 = vmatprep.subr.bf16.mxu0 %v4157_v3 }
 0x43b   :  { %2044 = vmatpush1.bf16.msra.mxu1 %v4159_v54  ;;  %2085 = vmatpush1.bf16.msra.mxu0 %v4161_v55 }
 0x43c   :  { %2045 = vmatprep.subr.bf16.mxu1 %v4167_v56  ;;  %2086 = vmatprep.subr.bf16.mxu0 %v4169_v57 }
 0x43f   :  { %2046 = vmatpush1.bf16.msra.mxu1 %v4171_v58  ;;  %2087 = vmatpush1.bf16.msra.mxu0 %v4173_v59 }
 0x440   :  { %2047 = vmatprep.subr.bf16.mxu1 %v4179_v44  ;;  %2088 = vmatprep.subr.bf16.mxu0 %v4181_v46 }
 0x443   :  { %2048 = vmatpush1.bf16.msra.mxu1 %v4183_v60  ;;  %2089 = vmatpush1.bf16.msra.mxu0 %v4185_v4 }
 0x444   :  { %2049 = vmatprep.subr.bf16.mxu1 %v4191_v63  ;;  %2090 = vmatprep.subr.bf16.mxu0 %v4193_v5 }
 0x447   :  { %2050 = vmatpush1.bf16.msra.mxu1 %v4195_v42  ;;  %2091 = vmatpush1.bf16.msra.mxu0 %v4197_v43 }
 0x448   :  { %2051 = vmatprep.subr.bf16.mxu1 %v4205_v50  ;;  %2092 = vmatprep.subr.bf16.mxu0 %v4209_v7 }
 0x44b   :  { %2052 = vmatpush1.bf16.msra.mxu1 %v4203_v10  ;;  %2093 = vmatpush1.bf16.msra.mxu0 %v4207_v11 }
 0x44c   :  { %2053 = vmatprep.subr.bf16.mxu1 %v4211_v49  ;;  %2094 = vmatprep.subr.bf16.mxu0 %v4214_v21 }
 0x44f   :  { %2054 = vmatpush1.bf16.msra.mxu1 %v4219_v13  ;;  %2095 = vmatpush1.bf16.msra.mxu0 %v4221_v48 }
 0x450   :  { %2055 = vmatprep.subr.bf16.mxu1 %v4225_v52  ;;  %2096 = vmatprep.subr.bf16.mxu0 %v4227_v12 }
 0x453   :  { %2056 = vmatpush1.bf16.msra.mxu1 %v4231_v61  ;;  %2097 = vmatpush1.bf16.msra.mxu0 %v4233_v62 }
 0x454   :  { %2344 = vmatprep.subr.bf16.mxu1 %v4143_v18  ;;  %2385 = vmatprep.subr.bf16.mxu0 %v4145_v47 }
 0x508   :  { %v1772_v1 = vpop.f32.mrb[28].mxu1  ;;  %v1813_v2 = vpop.f32.mrb[36].mxu0 }
 0x509   :  { %v1820_v9 = vadd.f32 %v1772_v1, %v4422_v8  ;;  %v1822_v15 = vadd.f32 %v1813_v2, %v4423_v14  ;;  %v1774_v19 = vpop.f32.mrb[29].mxu1  ;;  %v1815_v20 = vpop.f32.mrb[37].mxu0 }
 0x50a   :  { %v1821_v23 = vadd.f32 %v1774_v19, %v4424_v22  ;;  %v1823_v25 = vadd.f32 %v1815_v20, %v4425_v24  ;;  %v1776_v26 = vpop.f32.mrb[30].mxu1  ;;  %v1817_v27 = vpop.f32.mrb[38].mxu0  ;;  %v4426_v19 = vld [vmem:[#allocation18_spill] sm:$0xff]  ;;  %v4427_v22 = vld [vmem:[#allocation19_spill] sm:$0xff] }
 0x50b   :  { %v1824_v28 = vmul.f32 0.5, %v1820_v9  ;;  %v1777_v29 = vpop.f32.mrb[31].mxu1  ;;  %v1818_v30 = vpop.f32.mrb[39].mxu0  ;;  %v1826_v32 = vmul.f32 0.5, %v1822_v15  ;;  %v4428_v26 = vld [vmem:[#allocation20_spill] sm:$0xff] }
 0x50c   :  { %v1825_v31 = vmul.f32 0.5, %v1821_v23 }
 0x50d   :  { %3605 = vtanh.f32 %v1824_v28  ;;  %v4429_v28 = vld [vmem:[#allocation21_spill] sm:$0xff] }
 0x50e   :  { %3607 = vtanh.f32 %v1825_v31 }
 0x50f   :  { %3609 = vtanh.f32 %v1823_v25 }
 0x510   :  { %3611 = vtanh.f32 %v1826_v32 }
 0x517   :  { %v3606_v33 = vpop.eup %3605 }
 0x518   :  { %v1830_v34 = vmul.f32 0.5, %v3606_v33  ;;  %v3608_v35 = vpop.eup %3607 }
 0x519   :  { %v1831_v37 = vmul.f32 0.5, %v3608_v35  ;;  %v3610_v39 = vpop.eup %3609 }
 0x51a   :  { %v1833_v36 = vadd.f32 0.5, %v1830_v34  ;;  %v3612_v53 = vpop.eup %3611 }
 0x51b   :  { %v1834_v40 = vadd.f32 0.5, %v1831_v37  ;;  %v1832_v1 = vmul.f32 0.5, %v3612_v53 }
 0x51c   :  { %v1838_v41 = vmul.f32 %v3610_v39, %v1833_v36 }
 0x51d   :  { %v1837_v16 = vmul.f32 %v1834_v40, %v4138_v38  ;;  %v1835_v2 = vadd.f32 0.5, %v1832_v1 }
 0x51f   :  { %v4246_v17 = vadd.f32 %v1838_v41, %v1837_v16 }
 0x521   :  { %3613 = vtanh.f32 %v4246_v17 }
 0x52b   :  { %v3614_v8 = vpop.eup %3613 }
 0x52c   :  { %v1841_v9 = vmul.f32 %v3614_v8, %v1835_v2 }
 0x52e   :  { %1843 = vst [vmem:[#allocation8 + $0x18] sm:$0xff] %v1841_v9  ;;  %v1848_v14 = vpack.c.bf16 %v1841_v9, %v1841_v9 }
 0x530   :  { %2074 = vmatmul.mubr.bf16.vlgmr.msra.gmra.mrb[32].mxu1 %v1848_v14  ;;  %2115 = vmatmul.mubr.bf16.vlgmr.msra.gmra.mrb[40].mxu0 %v1848_v14 }
 0x531   :  { %2345 = vmatpush1.bf16.msra.mxu1 %v4147_v45  ;;  %2386 = vmatpush1.bf16.msra.mxu0 %v4149_v51 }
 0x532   :  { %2346 = vmatprep.subr.bf16.mxu1 %v4155_v0  ;;  %2387 = vmatprep.subr.bf16.mxu0 %v4157_v3 }
 0x533   :  { %2376 = vmatprep.mubr.bf16.mxu1 %v4419_v6  ;;  %2417 = vmatprep.mubr.bf16.mxu0 %v4419_v6 }
 0x535   :  { %2347 = vmatpush1.bf16.msra.mxu1 %v4159_v54  ;;  %2388 = vmatpush1.bf16.msra.mxu0 %v4161_v55 }
 0x536   :  { %2348 = vmatprep.subr.bf16.mxu1 %v4167_v56  ;;  %2389 = vmatprep.subr.bf16.mxu0 %v4169_v57 }
 0x539   :  { %2349 = vmatpush1.bf16.msra.mxu1 %v4171_v58  ;;  %2390 = vmatpush1.bf16.msra.mxu0 %v4173_v59 }
 0x53a   :  { %2350 = vmatprep.subr.bf16.mxu1 %v4179_v44  ;;  %2391 = vmatprep.subr.bf16.mxu0 %v4181_v46 }
 0x53d   :  { %2351 = vmatpush1.bf16.msra.mxu1 %v4183_v60  ;;  %2392 = vmatpush1.bf16.msra.mxu0 %v4185_v4 }
 0x53e   :  { %2352 = vmatprep.subr.bf16.mxu1 %v4191_v63  ;;  %2393 = vmatprep.subr.bf16.mxu0 %v4193_v5 }
 0x541   :  { %2353 = vmatpush1.bf16.msra.mxu1 %v4195_v42  ;;  %2394 = vmatpush1.bf16.msra.mxu0 %v4197_v43 }
 0x542   :  { %2354 = vmatprep.subr.bf16.mxu1 %v4205_v50  ;;  %2395 = vmatprep.subr.bf16.mxu0 %v4209_v7 }
 0x545   :  { %2355 = vmatpush1.bf16.msra.mxu1 %v4203_v10  ;;  %2396 = vmatpush1.bf16.msra.mxu0 %v4207_v11 }
 0x546   :  { %2356 = vmatprep.subr.bf16.mxu1 %v4211_v49  ;;  %2397 = vmatprep.subr.bf16.mxu0 %v4214_v21 }
 0x549   :  { %2357 = vmatpush1.bf16.msra.mxu1 %v4219_v13  ;;  %2398 = vmatpush1.bf16.msra.mxu0 %v4221_v48 }
 0x54a   :  { %2358 = vmatprep.subr.bf16.mxu1 %v4225_v52  ;;  %2399 = vmatprep.subr.bf16.mxu0 %v4227_v12 }
 0x54d   :  { %2359 = vmatpush1.bf16.msra.mxu1 %v4231_v61  ;;  %2400 = vmatpush1.bf16.msra.mxu0 %v4233_v62 }
 0x54e   :  { %2647 = vmatprep.subr.bf16.mxu1 %v4143_v18  ;;  %2688 = vmatprep.subr.bf16.mxu0 %v4145_v47 }
 0x603   :  { %v2075_v38 = vpop.f32.mrb[32].mxu1  ;;  %v2116_v15 = vpop.f32.mrb[40].mxu0 }
 0x604   :  { %v2123_v20 = vadd.f32 %v2075_v38, %v4426_v19  ;;  %v2125_v23 = vadd.f32 %v2116_v15, %v4427_v22  ;;  %v2077_v24 = vpop.f32.mrb[33].mxu1  ;;  %v2118_v25 = vpop.f32.mrb[41].mxu0 }
 0x605   :  { %v2124_v27 = vadd.f32 %v2077_v24, %v4428_v26  ;;  %v2126_v29 = vadd.f32 %v2118_v25, %v4429_v28  ;;  %v2079_v30 = vpop.f32.mrb[34].mxu1  ;;  %v2120_v31 = vpop.f32.mrb[42].mxu0  ;;  %v4430_v24 = vld [vmem:[#allocation22_spill] sm:$0xff]  ;;  %v4431_v26 = vld [vmem:[#allocation23_spill] sm:$0xff] }
 0x606   :  { %v2127_v32 = vmul.f32 0.5, %v2123_v20  ;;  %v2080_v33 = vpop.f32.mrb[35].mxu1  ;;  %v2121_v34 = vpop.f32.mrb[43].mxu0  ;;  %v2129_v36 = vmul.f32 0.5, %v2125_v23  ;;  %v4432_v30 = vld [vmem:[#allocation24_spill] sm:$0xff] }
 0x607   :  { %v2128_v35 = vmul.f32 0.5, %v2124_v27 }
 0x608   :  { %3615 = vtanh.f32 %v2127_v32  ;;  %v4433_v32 = vld [vmem:[#allocation25_spill] sm:$0xff] }
 0x609   :  { %3617 = vtanh.f32 %v2128_v35 }
 0x60a   :  { %3619 = vtanh.f32 %v2126_v29 }
 0x60b   :  { %3621 = vtanh.f32 %v2129_v36 }
 0x612   :  { %v3616_v37 = vpop.eup %3615 }
 0x613   :  { %v2133_v39 = vmul.f32 0.5, %v3616_v37  ;;  %v3618_v40 = vpop.eup %3617 }
 0x614   :  { %v2134_v16 = vmul.f32 0.5, %v3618_v40  ;;  %v3620_v53 = vpop.eup %3619 }
 0x615   :  { %v2136_v41 = vadd.f32 0.5, %v2133_v39  ;;  %v3622_v14 = vpop.eup %3621 }
 0x616   :  { %v2137_v1 = vadd.f32 0.5, %v2134_v16  ;;  %v2135_v38 = vmul.f32 0.5, %v3622_v14 }
 0x617   :  { %v2141_v2 = vmul.f32 %v3620_v53, %v2136_v41 }
 0x618   :  { %v2140_v8 = vmul.f32 %v2137_v1, %v4246_v17  ;;  %v2138_v15 = vadd.f32 0.5, %v2135_v38 }
 0x61a   :  { %v4288_v9 = vadd.f32 %v2141_v2, %v2140_v8 }
 0x61c   :  { %3623 = vtanh.f32 %v4288_v9 }
 0x626   :  { %v3624_v19 = vpop.eup %3623 }
 0x627   :  { %v2144_v20 = vmul.f32 %v3624_v19, %v2138_v15 }
 0x629   :  { %2146 = vst [vmem:[#allocation8 + $0x20] sm:$0xff] %v2144_v20  ;;  %v2151_v22 = vpack.c.bf16 %v2144_v20, %v2144_v20 }
 0x62b   :  { %2377 = vmatmul.mubr.bf16.vlgmr.msra.gmra.mrb[36].mxu1 %v2151_v22  ;;  %2418 = vmatmul.mubr.bf16.vlgmr.msra.gmra.mrb[44].mxu0 %v2151_v22 }
 0x62c   :  { %2648 = vmatpush1.bf16.msra.mxu1 %v4147_v45  ;;  %2689 = vmatpush1.bf16.msra.mxu0 %v4149_v51 }
 0x62d   :  { %2649 = vmatprep.subr.bf16.mxu1 %v4155_v0  ;;  %2690 = vmatprep.subr.bf16.mxu0 %v4157_v3 }
 0x62e   :  { %2679 = vmatprep.mubr.bf16.mxu1 %v4419_v6  ;;  %2720 = vmatprep.mubr.bf16.mxu0 %v4419_v6 }
 0x630   :  { %2650 = vmatpush1.bf16.msra.mxu1 %v4159_v54  ;;  %2691 = vmatpush1.bf16.msra.mxu0 %v4161_v55 }
 0x631   :  { %2651 = vmatprep.subr.bf16.mxu1 %v4167_v56  ;;  %2692 = vmatprep.subr.bf16.mxu0 %v4169_v57 }
 0x634   :  { %2652 = vmatpush1.bf16.msra.mxu1 %v4171_v58  ;;  %2693 = vmatpush1.bf16.msra.mxu0 %v4173_v59 }
 0x635   :  { %2653 = vmatprep.subr.bf16.mxu1 %v4179_v44  ;;  %2694 = vmatprep.subr.bf16.mxu0 %v4181_v46 }
 0x638   :  { %2654 = vmatpush1.bf16.msra.mxu1 %v4183_v60  ;;  %2695 = vmatpush1.bf16.msra.mxu0 %v4185_v4 }
 0x639   :  { %2655 = vmatprep.subr.bf16.mxu1 %v4191_v63  ;;  %2696 = vmatprep.subr.bf16.mxu0 %v4193_v5 }
 0x63c   :  { %2656 = vmatpush1.bf16.msra.mxu1 %v4195_v42  ;;  %2697 = vmatpush1.bf16.msra.mxu0 %v4197_v43 }
 0x63d   :  { %2657 = vmatprep.subr.bf16.mxu1 %v4205_v50  ;;  %2698 = vmatprep.subr.bf16.mxu0 %v4209_v7 }
 0x640   :  { %2658 = vmatpush1.bf16.msra.mxu1 %v4203_v10  ;;  %2699 = vmatpush1.bf16.msra.mxu0 %v4207_v11 }
 0x641   :  { %2659 = vmatprep.subr.bf16.mxu1 %v4211_v49  ;;  %2700 = vmatprep.subr.bf16.mxu0 %v4214_v21 }
 0x644   :  { %2660 = vmatpush1.bf16.msra.mxu1 %v4219_v13  ;;  %2701 = vmatpush1.bf16.msra.mxu0 %v4221_v48 }
 0x645   :  { %2661 = vmatprep.subr.bf16.mxu1 %v4225_v52  ;;  %2702 = vmatprep.subr.bf16.mxu0 %v4227_v12 }
 0x648   :  { %2662 = vmatpush1.bf16.msra.mxu1 %v4231_v61  ;;  %2703 = vmatpush1.bf16.msra.mxu0 %v4233_v62 }
 0x649   :  { %2950 = vmatprep.subr.bf16.mxu1 %v4143_v18  ;;  %2991 = vmatprep.subr.bf16.mxu0 %v4145_v47 }
 0x6fe   :  { %v2378_v17 = vpop.f32.mrb[36].mxu1  ;;  %v2419_v23 = vpop.f32.mrb[44].mxu0 }
 0x6ff   :  { %v2426_v25 = vadd.f32 %v2378_v17, %v4430_v24  ;;  %v2428_v27 = vadd.f32 %v2419_v23, %v4431_v26  ;;  %v2380_v28 = vpop.f32.mrb[37].mxu1  ;;  %v2421_v29 = vpop.f32.mrb[45].mxu0 }
 0x700   :  { %v2427_v31 = vadd.f32 %v2380_v28, %v4432_v30  ;;  %v2429_v33 = vadd.f32 %v2421_v29, %v4433_v32  ;;  %v2382_v34 = vpop.f32.mrb[38].mxu1  ;;  %v2423_v35 = vpop.f32.mrb[46].mxu0  ;;  %v4438_v30 = vld [vmem:[#allocation30_spill] sm:$0xff]  ;;  %v4439_v32 = vld [vmem:[#allocation31_spill] sm:$0xff] }
 0x701   :  { %v2430_v36 = vmul.f32 0.5, %v2426_v25  ;;  %v2383_v37 = vpop.f32.mrb[39].mxu1  ;;  %v2424_v39 = vpop.f32.mrb[47].mxu0  ;;  %v2432_v47 = vmul.f32 0.5, %v2428_v27 }
 0x702   :  { %v2431_v18 = vmul.f32 0.5, %v2427_v31  ;;  %v4441_v39 = vld [vmem:[#allocation33_spill] sm:$0xff] }
 0x703   :  { %3625 = vtanh.f32 %v2430_v36  ;;  %v4440_v36 = vld [vmem:[#allocation32_spill] sm:$0xff] }
 0x704   :  { %3627 = vtanh.f32 %v2431_v18 }
 0x705   :  { %3629 = vtanh.f32 %v2429_v33 }
 0x706   :  { %3631 = vtanh.f32 %v2432_v47 }
 0x70d   :  { %v3626_v40 = vpop.eup %3625 }
 0x70e   :  { %v2436_v41 = vmul.f32 0.5, %v3626_v40  ;;  %v3628_v16 = vpop.eup %3627 }
 0x70f   :  { %v2437_v1 = vmul.f32 0.5, %v3628_v16  ;;  %v3630_v2 = vpop.eup %3629 }
 0x710   :  { %v2439_v53 = vadd.f32 0.5, %v2436_v41  ;;  %v3632_v19 = vpop.eup %3631 }
 0x711   :  { %v2440_v8 = vadd.f32 0.5, %v2437_v1  ;;  %v2438_v20 = vmul.f32 0.5, %v3632_v19 }
 0x712   :  { %v2444_v14 = vmul.f32 %v3630_v2, %v2439_v53 }
 0x713   :  { %v2443_v38 = vmul.f32 %v2440_v8, %v4288_v9  ;;  %v2441_v22 = vadd.f32 0.5, %v2438_v20 }
 0x715   :  { %v4330_v15 = vadd.f32 %v2444_v14, %v2443_v38 }
 0x717   :  { %3633 = vtanh.f32 %v4330_v15 }
 0x721   :  { %v3634_v17 = vpop.eup %3633 }
 0x722   :  { %v2447_v23 = vmul.f32 %v3634_v17, %v2441_v22 }
 0x724   :  { %2449 = vst [vmem:[#allocation8 + $0x28] sm:$0xff] %v2447_v23  ;;  %v2454_v24 = vpack.c.bf16 %v2447_v23, %v2447_v23 }
 0x726   :  { %2680 = vmatmul.mubr.bf16.vlgmr.msra.gmra.mrb[40].mxu1 %v2454_v24  ;;  %2721 = vmatmul.mubr.bf16.vlgmr.msra.gmra.mrb[48].mxu0 %v2454_v24 }
 0x727   :  { %2951 = vmatpush1.bf16.msra.mxu1 %v4147_v45  ;;  %2992 = vmatpush1.bf16.msra.mxu0 %v4149_v51  ;;  %v4434_v51 = vld [vmem:[#allocation26_spill] sm:$0xff] }
 0x728   :  { %2952 = vmatprep.subr.bf16.mxu1 %v4155_v0  ;;  %2993 = vmatprep.subr.bf16.mxu0 %v4157_v3  ;;  %v4435_v3 = vld [vmem:[#allocation27_spill] sm:$0xff] }
 0x729   :  { %2982 = vmatprep.mubr.bf16.mxu1 %v4419_v6  ;;  %3023 = vmatprep.mubr.bf16.mxu0 %v4419_v6 }
 0x72b   :  { %2953 = vmatpush1.bf16.msra.mxu1 %v4159_v54  ;;  %2994 = vmatpush1.bf16.msra.mxu0 %v4161_v55 }
 0x72c   :  { %2954 = vmatprep.subr.bf16.mxu1 %v4167_v56  ;;  %2995 = vmatprep.subr.bf16.mxu0 %v4169_v57  ;;  %v4436_v57 = vld [vmem:[#allocation28_spill] sm:$0xff] }
 0x72f   :  { %2955 = vmatpush1.bf16.msra.mxu1 %v4171_v58  ;;  %2996 = vmatpush1.bf16.msra.mxu0 %v4173_v59  ;;  %v4437_v59 = vld [vmem:[#allocation29_spill] sm:$0xff] }
 0x730   :  { %2956 = vmatprep.subr.bf16.mxu1 %v4179_v44  ;;  %2997 = vmatprep.subr.bf16.mxu0 %v4181_v46 }
 0x733   :  { %2957 = vmatpush1.bf16.msra.mxu1 %v4183_v60  ;;  %2998 = vmatpush1.bf16.msra.mxu0 %v4185_v4 }
 0x734   :  { %2958 = vmatprep.subr.bf16.mxu1 %v4191_v63  ;;  %2999 = vmatprep.subr.bf16.mxu0 %v4193_v5 }
 0x737   :  { %2959 = vmatpush1.bf16.msra.mxu1 %v4195_v42  ;;  %3000 = vmatpush1.bf16.msra.mxu0 %v4197_v43 }
 0x738   :  { %2960 = vmatprep.subr.bf16.mxu1 %v4205_v50  ;;  %3001 = vmatprep.subr.bf16.mxu0 %v4209_v7 }
 0x73b   :  { %2961 = vmatpush1.bf16.msra.mxu1 %v4203_v10  ;;  %3002 = vmatpush1.bf16.msra.mxu0 %v4207_v11 }
 0x73c   :  { %2962 = vmatprep.subr.bf16.mxu1 %v4211_v49  ;;  %3003 = vmatprep.subr.bf16.mxu0 %v4214_v21 }
 0x73f   :  { %2963 = vmatpush1.bf16.msra.mxu1 %v4219_v13  ;;  %3004 = vmatpush1.bf16.msra.mxu0 %v4221_v48 }
 0x740   :  { %2964 = vmatprep.subr.bf16.mxu1 %v4225_v52  ;;  %3005 = vmatprep.subr.bf16.mxu0 %v4227_v12 }
 0x743   :  { %2965 = vmatpush1.bf16.msra.mxu1 %v4231_v61  ;;  %3006 = vmatpush1.bf16.msra.mxu0 %v4233_v62 }
 0x7f9   :  { %v2681_v6 = vpop.f32.mrb[40].mxu1  ;;  %v2722_v45 = vpop.f32.mrb[48].mxu0 }
 0x7fa   :  { %v2729_v0 = vadd.f32 %v2681_v6, %v4434_v51  ;;  %v2731_v54 = vadd.f32 %v2722_v45, %v4435_v3  ;;  %v2683_v55 = vpop.f32.mrb[41].mxu1  ;;  %v2724_v56 = vpop.f32.mrb[49].mxu0 }
 0x7fb   :  { %v2730_v58 = vadd.f32 %v2683_v55, %v4436_v57  ;;  %v2732_v44 = vadd.f32 %v2724_v56, %v4437_v59  ;;  %v2685_v46 = vpop.f32.mrb[42].mxu1  ;;  %v2726_v60 = vpop.f32.mrb[50].mxu0 }
 0x7fc   :  { %v2733_v4 = vmul.f32 0.5, %v2729_v0  ;;  %v2686_v63 = vpop.f32.mrb[43].mxu1  ;;  %v2727_v5 = vpop.f32.mrb[51].mxu0  ;;  %v2735_v43 = vmul.f32 0.5, %v2731_v54 }
 0x7fd   :  { %v2734_v42 = vmul.f32 0.5, %v2730_v58 }
 0x7fe   :  { %3635 = vtanh.f32 %v2733_v4 }
 0x7ff   :  { %3637 = vtanh.f32 %v2734_v42 }
 0x800   :  { %3639 = vtanh.f32 %v2732_v44 }
 0x801   :  { %3641 = vtanh.f32 %v2735_v43 }
 0x808   :  { %v3636_v10 = vpop.eup %3635 }
 0x809   :  { %v2739_v50 = vmul.f32 0.5, %v3636_v10  ;;  %v3638_v11 = vpop.eup %3637 }
 0x80a   :  { %v2740_v49 = vmul.f32 0.5, %v3638_v11  ;;  %v3640_v21 = vpop.eup %3639 }
 0x80b   :  { %v2742_v7 = vadd.f32 0.5, %v2739_v50  ;;  %v3642_v61 = vpop.eup %3641 }
 0x80c   :  { %v2743_v13 = vadd.f32 0.5, %v2740_v49  ;;  %v2741_v62 = vmul.f32 0.5, %v3642_v61 }
 0x80d   :  { %v2747_v48 = vmul.f32 %v3640_v21, %v2742_v7 }
 0x80e   :  { %v2746_v52 = vmul.f32 %v2743_v13, %v4330_v15  ;;  %v2744_v9 = vadd.f32 0.5, %v2741_v62 }
 0x810   :  { %v2748_v12 = vadd.f32 %v2747_v48, %v2746_v52 }
 0x812   :  { %3643 = vtanh.f32 %v2748_v12 }
 0x81c   :  { %v3644_v25 = vpop.eup %3643 }
 0x81d   :  { %v2750_v26 = vmul.f32 %v3644_v25, %v2744_v9 }
 0x81f   :  { %2752 = vst [vmem:[#allocation8 + $0x30] sm:$0xff] %v2750_v26  ;;  %v2757_v27 = vpack.c.bf16 %v2750_v26, %v2750_v26 }
 0x821   :  { %2983 = vmatmul.mubr.bf16.vlgmr.msra.gmra.mrb[44].mxu1 %v2757_v27  ;;  %3024 = vmatmul.mubr.bf16.vlgmr.msra.gmra.mrb[52].mxu0 %v2757_v27 }
 0x8f4   :  { %v2984_v28 = vpop.f32.mrb[44].mxu1  ;;  %v3025_v29 = vpop.f32.mrb[52].mxu0 }
 0x8f5   :  { %v3032_v31 = vadd.f32 %v2984_v28, %v4438_v30  ;;  %v3034_v33 = vadd.f32 %v3025_v29, %v4439_v32  ;;  %v2986_v34 = vpop.f32.mrb[45].mxu1  ;;  %v3027_v35 = vpop.f32.mrb[53].mxu0 }
 0x8f6   :  { %v3033_v37 = vadd.f32 %v2986_v34, %v4440_v36  ;;  %v3035_v18 = vadd.f32 %v3027_v35, %v4441_v39  ;;  %v2988_v47 = vpop.f32.mrb[46].mxu1  ;;  %v3029_v40 = vpop.f32.mrb[54].mxu0 }
 0x8f7   :  { %v3036_v41 = vmul.f32 0.5, %v3032_v31  ;;  %v2989_v16 = vpop.f32.mrb[47].mxu1  ;;  %v3030_v53 = vpop.f32.mrb[55].mxu0  ;;  %v3038_v2 = vmul.f32 0.5, %v3034_v33 }
 0x8f8   :  { %v3037_v1 = vmul.f32 0.5, %v3033_v37 }
 0x8f9   :  { %3645 = vtanh.f32 %v3036_v41 }
 0x8fa   :  { %3647 = vtanh.f32 %v3037_v1 }
 0x8fb   :  { %3649 = vtanh.f32 %v3035_v18 }
 0x8fc   :  { %3651 = vtanh.f32 %v3038_v2 }
 0x903   :  { %v3646_v8 = vpop.eup %3645 }
 0x904   :  { %v3042_v14 = vmul.f32 0.5, %v3646_v8  ;;  %v3648_v38 = vpop.eup %3647 }
 0x905   :  { %v3043_v19 = vmul.f32 0.5, %v3648_v38  ;;  %v3650_v20 = vpop.eup %3649 }
 0x906   :  { %v3045_v15 = vadd.f32 0.5, %v3042_v14  ;;  %v3652_v6 = vpop.eup %3651 }
 0x907   :  { %v3046_v22 = vadd.f32 0.5, %v3043_v19  ;;  %v3044_v45 = vmul.f32 0.5, %v3652_v6 }
 0x908   :  { %v3050_v17 = vmul.f32 %v3650_v20, %v3045_v15 }
 0x909   :  { %v3049_v23 = vmul.f32 %v3046_v22, %v2748_v12  ;;  %v3047_v51 = vadd.f32 0.5, %v3044_v45 }
 0x90b   :  { %v3051_v24 = vadd.f32 %v3050_v17, %v3049_v23 }
 0x90d   :  { %3653 = vtanh.f32 %v3051_v24 }
 0x917   :  { %v3654_v0 = vpop.eup %3653 }
 0x918   :  { %v3053_v3 = vmul.f32 %v3654_v0, %v3047_v51 }
 0x91a   :  { %3055 = vst [vmem:[#allocation8 + $0x38] sm:$0xff] %v3053_v3 }
 0x91b   :  { %3710 = shalt.err (!%p3707_p6)
}
 0x91c   :  { %s3711_s14 = scalar_lea.hbm %s4394_s8, 1024 }
 0x91d   :  { %p3712_p7 = scmp.ne.s32.totalorder %s4394_s8, %s3711_s14  ;;  %p3715_p8 = scmp.lt.u32.totalorder %s3711_s14, %s4394_s8 }
 0x91f   :  { %p3717_p9 = pnand %p3715_p8, %p3712_p7 }
 0x921   :  { %3720 = shalt.err (!%p3717_p9)
}
 0x922   :  { %s3733_s19 = smov 128   ;;  %s3734_s20 = smov 8  }
 0x923   :  { %3067 = dma.vmem_to_hbm [thread:$0]  %s3062_s11, 1024, %s4394_s8, [#allocation5], %s3733_s19, %s3733_s19, %s3734_s20  }
 0x924   :  { %3725 = dma.done.wait [#allocation5], 1024  }
 0x925   :  { %3726 = vsyncadd [#allocation5], 4294966272 }
 0x926   :  { %3071 = vsyncpa [#allocation4], 1 }
 0x927   :  { %3072 = vsyncpa [#allocation7], 1 }
 0x928   :  { %3073 = vsyncpa [#allocation5], 1 }

</bundles_post_ra>
